<compile_context>
chip_gen: v5e
topology: v5e:2x2
jax: 0.10.0
libtpu: 0.0.40
codegen_flags: <defaults>
</compile_context>

<pallas_src>
import functools

import jax
import jax.numpy as jnp
from jax.experimental import pallas as pl
from jax.experimental.pallas import tpu as pltpu


# ----------------------------------------------------------------------------
# Kernel
# ----------------------------------------------------------------------------
def _layer_norm(x, gamma, beta, eps=1e-5):
    mu = jnp.mean(x, axis=-1, keepdims=True)
    var = jnp.mean((x - mu) ** 2, axis=-1, keepdims=True)
    return (x - mu) * jax.lax.rsqrt(var + eps) * gamma + beta


def fused_transformer_kernel(x_ref,
                             wqkv_ref, bqkv_ref, wo_ref, bo_ref,
                             ln1g_ref, ln1b_ref,
                             w1_ref, b1_ref, w2_ref, b2_ref,
                             ln2g_ref, ln2b_ref,
                             wout_ref, bout_ref,
                             o_ref, h_scr,
                             *, batch, seq, num_heads, head_dim):
    """grid=(L,): whole (B*S, D) token block per layer step; hidden state stays
    resident in VMEM scratch across layers, weights streamed once per layer."""
    layer = pl.program_id(0)
    dim = num_heads * head_dim
    n_tok = batch * seq
    scale = 1.0 / (head_dim ** 0.5)

    # ---- init residency with the embedded input at the first layer ----
    @pl.when(layer == 0)
    def _():
        h_scr[...] = x_ref[...].astype(jnp.float32)

    h = h_scr[...]                                    # (N, D) f32
    h_b = h.astype(jnp.bfloat16)

    # ---- fused QKV projection with lane-dense bias: (N, D) @ (D, 3D) ----
    qkv = jax.lax.dot_general(h_b, wqkv_ref[0], (((1,), (0,)), ((), ())),
                              preferred_element_type=jnp.float32) + bqkv_ref[0]

    # ---- head-batched transposed views: one tiny 2-D transpose, then free
    # sublane-aligned reshapes / leading-dim slices (offsets multiples of 8) ----
    qkv_t = qkv.T.reshape(3, num_heads, head_dim, n_tok)       # (3, H, Hd, N)
    q_t = qkv_t[0].astype(jnp.bfloat16)                         # (H, Hd, N)
    k_t = qkv_t[1].astype(jnp.bfloat16)
    v_t = qkv_t[2].astype(jnp.bfloat16)

    # ---- block-diagonal batch mask (VPU, tiny): keeps attention within each
    # batch element while all heads & batches share one fused score batch.
    # float trick (+0.5 before floor) avoids relying on vector int division. ----
    r = jax.lax.broadcasted_iota(jnp.int32, (n_tok, n_tok), 0).astype(jnp.float32)
    c = jax.lax.broadcasted_iota(jnp.int32, (n_tok, n_tok), 1).astype(jnp.float32)
    inv_s = 1.0 / seq
    same_b = jnp.floor((r + 0.5) * inv_s) == jnp.floor((c + 0.5) * inv_s)
    neg_mask = jnp.where(same_b, 0.0, -1e30).astype(jnp.float32)

    # ---- head-batched scaled dot-product attention (single dot_general pair) ----
    s = jax.lax.dot_general(q_t, k_t, (((1,), (1,)), ((0,), (0,))),
                            preferred_element_type=jnp.float32)  # (H, N, N)
    s = s * scale + neg_mask[None, :, :]
    s = s - jnp.max(s, axis=-1, keepdims=True)
    p = jnp.exp(s)
    # approx reciprocal runs on the EUP slot; use approx=False for exact parity.
    p = p * pl.reciprocal(jnp.sum(p, axis=-1, keepdims=True), approx=True)

    ctx_t = jax.lax.dot_general(v_t, p.astype(jnp.bfloat16),
                                (((2,), (2,)), ((0,), (0,))),
                                preferred_element_type=jnp.float32)  # (H, Hd, N)
    ctx = ctx_t.reshape(dim, n_tok).astype(jnp.bfloat16)             # (D, N), free merge

    # ---- single fused out-projection over all heads ----
    attn = jax.lax.dot_general(ctx, wo_ref[0], (((0,), (0,)), ((), ())),
                               preferred_element_type=jnp.float32) + bo_ref[0]

    # ---- residual + LayerNorm 1 (f32, post-LN) ----
    h1 = _layer_norm(h + attn, ln1g_ref[0], ln1b_ref[0])

    # ---- feed-forward (ReLU), bf16 matmuls with f32 accumulation ----
    ff = jnp.dot(h1.astype(jnp.bfloat16), w1_ref[0],
                 preferred_element_type=jnp.float32) + b1_ref[0]      # (N, F)
    ff = jnp.maximum(ff, 0.0)
    ff = jnp.dot(ff.astype(jnp.bfloat16), w2_ref[0],
                 preferred_element_type=jnp.float32) + b2_ref[0]      # (N, D)

    # ---- residual + LayerNorm 2, keep resident for next layer ----
    h2 = _layer_norm(h1 + ff, ln2g_ref[0], ln2b_ref[0])
    h_scr[...] = h2

    # ---- fused vocab projection at the last layer (lane-dense padded V) ----
    @pl.when(layer == pl.num_programs(0) - 1)
    def _():
        o_ref[...] = jnp.dot(h2.astype(jnp.bfloat16), wout_ref[...],
                             preferred_element_type=jnp.float32) + bout_ref[...]


# ----------------------------------------------------------------------------
# Wrapper
# ----------------------------------------------------------------------------
def bidirectional_transformer_forward(x_tokens, params, *, num_heads, head_dim):
    """Equivalent of BidirectionalTransformer.forward(x) (eval mode)."""
    B, S = x_tokens.shape
    D = num_heads * head_dim
    L = params["wqkv"].shape[0]
    F = params["w1"].shape[2]
    Vp = params["w_out"].shape[1]
    V = params["vocab_size"]
    N = B * S
    H, Hd = num_heads, head_dim

    # embedding lookup + positional embedding (gather glue stays in plain JAX);
    # fed to the kernel as a flat (B*S, D) bf16 block (halves activation DMA).
    h0 = (jnp.take(params["token"], x_tokens, axis=0)
          + params["pos"][:S][None, :, :])
    h0 = h0.reshape(N, D).astype(jnp.bfloat16)

    def layer_spec(arr):
        zeros = (0,) * (arr.ndim - 1)
        return pl.BlockSpec((1,) + arr.shape[1:], lambda l, _z=zeros: (l,) + _z)

    def const_spec(arr):
        zeros = (0,) * arr.ndim
        return pl.BlockSpec(arr.shape, lambda l, _z=zeros: _z)

    weight_keys = ["wqkv", "bqkv", "wo", "bo", "ln1_g", "ln1_b",
                   "w1", "b1", "w2", "b2", "ln2_g", "ln2_b"]
    weights = [params[k] for k in weight_keys]

    # Cost estimate: per-layer weights are fetched once per layer (not x B).
    flops = int(L * (2 * N * D * 3 * D              # fused QKV
                     + 4 * H * N * N * Hd           # scores + context (masked NxN)
                     + 2 * N * D * D                # out projection
                     + 4 * N * D * F)               # FFN (two matmuls)
                + 2 * N * D * Vp)                   # vocab projection
    transcendentals = int(L * (H * N * N + H * N + 2 * N))
    bytes_accessed = int(h0.nbytes + N * Vp * 4
                         + sum(int(w.nbytes) for w in weights)
                         + int(params["w_out"].nbytes)
                         + int(params["b_out"].nbytes))

    logits = pl.pallas_call(
        functools.partial(fused_transformer_kernel, batch=B, seq=S,
                          num_heads=num_heads, head_dim=head_dim),
        out_shape=jax.ShapeDtypeStruct((N, Vp), jnp.float32),
        grid=(L,),
        in_specs=[const_spec(h0)] + [layer_spec(w) for w in weights]
                 + [const_spec(params["w_out"]), const_spec(params["b_out"])],
        out_specs=pl.BlockSpec((N, Vp), lambda l: (0, 0)),
        scratch_shapes=[pltpu.VMEM((N, D), jnp.float32)],
        compiler_params=pltpu.CompilerParams(
            dimension_semantics=("arbitrary",),
            vmem_limit_bytes=32 * 1024 * 1024),
        cost_estimate=pl.CostEstimate(flops=flops,
                                      transcendentals=transcendentals,
                                      bytes_accessed=bytes_accessed),
    )(h0, *weights, params["w_out"], params["b_out"])

    return logits.reshape(B, S, Vp)[:, :, :V]


# ----------------------------------------------------------------------------
# Deterministic synthetic parameter construction
# ----------------------------------------------------------------------------
def init_params(key, *, dim, heads, layers, vocab_size, ffn_dim, max_pos=512):
    del heads  # head count only affects how the kernel reshapes the fused QKV
    keys = iter(jax.random.split(key, 8 + 8 * layers))
    rnd = lambda shape, s=0.02: (s * jax.random.normal(next(keys), shape)
                                 ).astype(jnp.float32)

    vpad = ((vocab_size + 127) // 128) * 128          # lane-dense padded vocab
    w_out = jnp.pad(rnd((dim, vocab_size)), ((0, 0), (0, vpad - vocab_size)))
    b_out = jnp.pad(rnd((1, vocab_size)), ((0, 0), (0, vpad - vocab_size)))

    wqkv, bqkv, wo, bo, w1, b1, w2, b2 = ([] for _ in range(8))
    for _ in range(layers):
        wqkv.append(rnd((dim, 3 * dim)))   # = in_proj_weight.T (q;k;v columns)
        bqkv.append(rnd((1, 3 * dim)))     # lane-dense in_proj_bias
        wo.append(rnd((dim, dim)))         # = out_proj.weight.T (in, out)
        bo.append(rnd((1, dim)))
        w1.append(rnd((dim, ffn_dim)))     # = linear1.weight.T
        b1.append(rnd((1, ffn_dim)))
        w2.append(rnd((ffn_dim, dim)))     # = linear2.weight.T
        b2.append(rnd((1, dim)))

    ones = lambda shape: jnp.ones(shape, jnp.float32)
    zeros = lambda shape: jnp.zeros(shape, jnp.float32)

    return {
        "token": rnd((vocab_size, dim)),
        "pos": rnd((max_pos, dim)),
        "w_out": w_out.astype(jnp.bfloat16),            # (D, Vp)
        "b_out": b_out,                                  # (1, Vp) f32
        "vocab_size": vocab_size,
        "wqkv": jnp.stack(wqkv).astype(jnp.bfloat16),    # (L, D, 3D)
        "bqkv": jnp.stack(bqkv),                         # (L, 1, 3D) f32
        "wo": jnp.stack(wo).astype(jnp.bfloat16),        # (L, D, D)
        "bo": jnp.stack(bo),                             # (L, 1, D)
        "ln1_g": ones((layers, 1, dim)),
        "ln1_b": zeros((layers, 1, dim)),
        "w1": jnp.stack(w1).astype(jnp.bfloat16),        # (L, D, F)
        "b1": jnp.stack(b1),                             # (L, 1, F)
        "w2": jnp.stack(w2).astype(jnp.bfloat16),        # (L, F, D)
        "b2": jnp.stack(b2),                             # (L, 1, D)
        "ln2_g": ones((layers, 1, dim)),
        "ln2_b": zeros((layers, 1, dim)),
    }


# ----------------------------------------------------------------------------
# Main
# ----------------------------------------------------------------------------
if __name__ == "__main__":
    DIM = 32          # model dim
    HEADS = 4         # attention heads -> head_dim = 8
    LAYERS = 2        # encoder layers
    VOCAB = 100       # vocab size (padded to 128 internally)
    FFN = 2048        # PyTorch TransformerEncoderLayer default dim_feedforward
    BATCH, SEQ = 2, 8

    key = jax.random.PRNGKey(0)
    k_params, k_tokens = jax.random.split(key)

    params = init_params(k_params, dim=DIM, heads=HEADS, layers=LAYERS,
                         vocab_size=VOCAB, ffn_dim=FFN)
    x = jax.random.randint(k_tokens, (BATCH, SEQ), 0, VOCAB, dtype=jnp.int32)

    logits = bidirectional_transformer_forward(
        x, params, num_heads=HEADS, head_dim=DIM // HEADS)
    logits = jax.block_until_ready(logits)

    assert logits.shape == (BATCH, SEQ, VOCAB), logits.shape
    assert logits.dtype == jnp.float32
    assert bool(jnp.all(jnp.isfinite(logits)))
    print("KERNEL_OK")
</pallas_src>

<mosaic_0001>
module attributes {stable_mosaic.version = 11 : i64} {
  func.func @fused_transformer_kernel(%arg0: i32, %arg1: memref<16x32xbf16, #tpu.memory_space<vmem>>, %arg2: memref<1x32x96xbf16, #tpu.memory_space<vmem>>, %arg3: memref<1x1x96xf32, #tpu.memory_space<vmem>>, %arg4: memref<1x32x32xbf16, #tpu.memory_space<vmem>>, %arg5: memref<1x1x32xf32, #tpu.memory_space<vmem>>, %arg6: memref<1x1x32xf32, #tpu.memory_space<vmem>>, %arg7: memref<1x1x32xf32, #tpu.memory_space<vmem>>, %arg8: memref<1x32x2048xbf16, #tpu.memory_space<vmem>>, %arg9: memref<1x1x2048xf32, #tpu.memory_space<vmem>>, %arg10: memref<1x2048x32xbf16, #tpu.memory_space<vmem>>, %arg11: memref<1x1x32xf32, #tpu.memory_space<vmem>>, %arg12: memref<1x1x32xf32, #tpu.memory_space<vmem>>, %arg13: memref<1x1x32xf32, #tpu.memory_space<vmem>>, %arg14: memref<32x128xbf16, #tpu.memory_space<vmem>>, %arg15: memref<1x128xf32, #tpu.memory_space<vmem>>, %arg16: memref<16x128xf32, #tpu.memory_space<vmem>>, %arg17: memref<16x32xf32, #tpu.memory_space<vmem>>) attributes {dimension_semantics = [#tpu.dimension_semantics<arbitrary>], iteration_bounds = array<i64: 2>, scalar_prefetch = 0 : i64, scratch_operands = 1 : i64, tpu.core_type = #tpu.core_type<tc>, window_params = [{pipeline_mode = #tpu.pipeline_mode<synchronous>, transform_indices = @transform_0, window_bounds = array<i64: 16, 32>}, {transform_indices = @transform_1, window_bounds = array<i64: 1, 32, 96>}, {transform_indices = @transform_2, window_bounds = array<i64: 1, 1, 96>}, {transform_indices = @transform_3, window_bounds = array<i64: 1, 32, 32>}, {transform_indices = @transform_4, window_bounds = array<i64: 1, 1, 32>}, {transform_indices = @transform_5, window_bounds = array<i64: 1, 1, 32>}, {transform_indices = @transform_6, window_bounds = array<i64: 1, 1, 32>}, {transform_indices = @transform_7, window_bounds = array<i64: 1, 32, 2048>}, {transform_indices = @transform_8, window_bounds = array<i64: 1, 1, 2048>}, {transform_indices = @transform_9, window_bounds = array<i64: 1, 2048, 32>}, {transform_indices = @transform_10, window_bounds = array<i64: 1, 1, 32>}, {transform_indices = @transform_11, window_bounds = array<i64: 1, 1, 32>}, {transform_indices = @transform_12, window_bounds = array<i64: 1, 1, 32>}, {pipeline_mode = #tpu.pipeline_mode<synchronous>, transform_indices = @transform_13, window_bounds = array<i64: 32, 128>}, {pipeline_mode = #tpu.pipeline_mode<synchronous>, transform_indices = @transform_14, window_bounds = array<i64: 1, 128>}, {pipeline_mode = #tpu.pipeline_mode<synchronous>, transform_indices = @transform_15, window_bounds = array<i64: 16, 128>}]} {
    %c0_i32 = arith.constant 0 : i32
    %0 = arith.cmpi eq, %arg0, %c0_i32 : i32
    %1 = arith.extui %0 : i1 to i32
    %c0_i32_0 = arith.constant 0 : i32
    %2 = arith.cmpi ne, %1, %c0_i32_0 : i32
    scf.if %2 {
      %c0_66 = arith.constant 0 : index
      %c0_67 = arith.constant 0 : index
      %144 = vector.load %arg1[%c0_66, %c0_67] : memref<16x32xbf16, #tpu.memory_space<vmem>>, vector<16x32xbf16>
      %145 = arith.extf %144 : vector<16x32xbf16> to vector<16x32xf32>
      %c0_68 = arith.constant 0 : index
      %c0_69 = arith.constant 0 : index
      %146 = vector.load %arg17[%c0_68, %c0_69] : memref<16x32xf32, #tpu.memory_space<vmem>>, vector<16x32xf32>
      tpu.vector_store %arg17[%c0_68, %c0_69], %145 {strides = array<i32>} : memref<16x32xf32, #tpu.memory_space<vmem>>, vector<16x32xf32>,
    } else {
    }
    %c0 = arith.constant 0 : index
    %c0_1 = arith.constant 0 : index
    %3 = vector.load %arg17[%c0, %c0_1] : memref<16x32xf32, #tpu.memory_space<vmem>>, vector<16x32xf32>
    %4 = arith.truncf %3 : vector<16x32xf32> to vector<16x32xbf16>
    %c0_2 = arith.constant 0 : index
    %c0_3 = arith.constant 0 : index
    %c0_4 = arith.constant 0 : index
    %5 = vector.load %arg2[%c0_2, %c0_3, %c0_4] : memref<1x32x96xbf16, #tpu.memory_space<vmem>>, vector<1x32x96xbf16>
    %6 = vector.shape_cast %5 : vector<1x32x96xbf16> to vector<32x96xbf16>
    %cst = arith.constant dense<0.000000e+00> : vector<16x96xf32>
    %7 = tpu.matmul %4, %6, %cst {dimension_numbers = #tpu.dot_dimension_numbers<[1], [0], [0], [1], [0, 0, 1, 1], [], []>} : vector<16x32xbf16>, vector<32x96xbf16>, vector<16x96xf32> -> vector<16x96xf32>
    %c0_5 = arith.constant 0 : index
    %c0_6 = arith.constant 0 : index
    %c0_7 = arith.constant 0 : index
    %8 = vector.load %arg3[%c0_5, %c0_6, %c0_7] : memref<1x1x96xf32, #tpu.memory_space<vmem>>, vector<1x1x96xf32>
    %9 = vector.shape_cast %8 : vector<1x1x96xf32> to vector<1x96xf32>
    %10 = vector.broadcast %9 : vector<1x96xf32> to vector<16x96xf32>
    %11 = arith.addf %7, %10 : vector<16x96xf32>
    %12 = tpu.transpose %11, [1, 0] : vector<16x96xf32> -> vector<96x16xf32>
    %13 = vector.shape_cast %12 : vector<96x16xf32> to vector<3x4x8x16xf32>
    %14 = vector.extract_strided_slice %13 {offsets = [0, 0, 0, 0], sizes = [1, 4, 8, 16], strides = [1, 1, 1, 1]} : vector<3x4x8x16xf32> to vector<1x4x8x16xf32>
    %15 = vector.shape_cast %14 : vector<1x4x8x16xf32> to vector<4x8x16xf32>
    %16 = arith.truncf %15 : vector<4x8x16xf32> to vector<4x8x16xbf16>
    %17 = vector.extract_strided_slice %13 {offsets = [1, 0, 0, 0], sizes = [1, 4, 8, 16], strides = [1, 1, 1, 1]} : vector<3x4x8x16xf32> to vector<1x4x8x16xf32>
    %18 = vector.shape_cast %17 : vector<1x4x8x16xf32> to vector<4x8x16xf32>
    %19 = arith.truncf %18 : vector<4x8x16xf32> to vector<4x8x16xbf16>
    %20 = vector.extract_strided_slice %13 {offsets = [2, 0, 0, 0], sizes = [1, 4, 8, 16], strides = [1, 1, 1, 1]} : vector<3x4x8x16xf32> to vector<1x4x8x16xf32>
    %21 = vector.shape_cast %20 : vector<1x4x8x16xf32> to vector<4x8x16xf32>
    %22 = arith.truncf %21 : vector<4x8x16xf32> to vector<4x8x16xbf16>
    %23 = tpu.iota {dimensions = array<i32: 0>} : vector<16x16xi32>
    %24 = arith.sitofp %23 : vector<16x16xi32> to vector<16x16xf32>
    %25 = tpu.iota {dimensions = array<i32: 1>} : vector<16x16xi32>
    %26 = arith.sitofp %25 : vector<16x16xi32> to vector<16x16xf32>
    %cst_8 = arith.constant 5.000000e-01 : f32
    %27 = vector.broadcast %cst_8 : f32 to vector<16x16xf32>
    %28 = arith.addf %24, %27 : vector<16x16xf32>
    %cst_9 = arith.constant 1.250000e-01 : f32
    %29 = vector.broadcast %cst_9 : f32 to vector<16x16xf32>
    %30 = arith.mulf %28, %29 : vector<16x16xf32>
    %31 = math.floor %30 : vector<16x16xf32>
    %cst_10 = arith.constant 5.000000e-01 : f32
    %32 = vector.broadcast %cst_10 : f32 to vector<16x16xf32>
    %33 = arith.addf %26, %32 : vector<16x16xf32>
    %cst_11 = arith.constant 1.250000e-01 : f32
    %34 = vector.broadcast %cst_11 : f32 to vector<16x16xf32>
    %35 = arith.mulf %33, %34 : vector<16x16xf32>
    %36 = math.floor %35 : vector<16x16xf32>
    %37 = arith.cmpf oeq, %31, %36 : vector<16x16xf32>
    %cst_12 = arith.constant 0.000000e+00 : f32
    %cst_13 = arith.constant -1.000000e+30 : f32
    %38 = vector.broadcast %cst_12 : f32 to vector<16x16xf32>
    %39 = vector.broadcast %cst_13 : f32 to vector<16x16xf32>
    %40 = arith.select %37, %38, %39 : vector<16x16xi1>, vector<16x16xf32>
    %cst_14 = arith.constant dense<0.000000e+00> : vector<4x16x16xf32>
    %41 = tpu.matmul %16, %19, %cst_14 {dimension_numbers = #tpu.dot_dimension_numbers<[1], [1], [2], [2], [0, 0, 0, 2, 1, 2], [0], [0]>} : vector<4x8x16xbf16>, vector<4x8x16xbf16>, vector<4x16x16xf32> -> vector<4x16x16xf32>
    %cst_15 = arith.constant 0.353553385 : f32
    %42 = vector.broadcast %cst_15 : f32 to vector<4x16x16xf32>
    %43 = arith.mulf %41, %42 : vector<4x16x16xf32>
    %44 = vector.shape_cast %40 : vector<16x16xf32> to vector<1x16x16xf32>
    %45 = vector.broadcast %44 : vector<1x16x16xf32> to vector<4x16x16xf32>
    %46 = arith.addf %43, %45 : vector<4x16x16xf32>
    %cst_16 = arith.constant dense<0xFF800000> : vector<4x16xf32>
    %47 = vector.multi_reduction <maximumf>, %46, %cst_16 [2] : vector<4x16x16xf32> to vector<4x16xf32>
    %48 = vector.shape_cast %47 : vector<4x16xf32> to vector<4x16x1xf32>
    %49 = vector.broadcast %48 : vector<4x16x1xf32> to vector<4x16x16xf32>
    %50 = arith.subf %46, %49 : vector<4x16x16xf32>
    %51 = math.exp %50 : vector<4x16x16xf32>
    %cst_17 = arith.constant dense<0.000000e+00> : vector<4x16xf32>
    %52 = vector.multi_reduction <add>, %51, %cst_17 [2] : vector<4x16x16xf32> to vector<4x16xf32>
    %53 = vector.shape_cast %52 : vector<4x16xf32> to vector<4x16x1xf32>
    %54 = tpu.reciprocal %53 {approx = true} : vector<4x16x1xf32> -> vector<4x16x1xf32>
    %55 = vector.broadcast %54 : vector<4x16x1xf32> to vector<4x16x16xf32>
    %56 = arith.mulf %51, %55 : vector<4x16x16xf32>
    %57 = arith.truncf %56 : vector<4x16x16xf32> to vector<4x16x16xbf16>
    %cst_18 = arith.constant dense<0.000000e+00> : vector<4x8x16xf32>
    %58 = tpu.matmul %22, %57, %cst_18 {dimension_numbers = #tpu.dot_dimension_numbers<[2], [2], [1], [1], [0, 0, 0, 1, 1, 1], [0], [0]>} : vector<4x8x16xbf16>, vector<4x16x16xbf16>, vector<4x8x16xf32> -> vector<4x8x16xf32>
    %59 = vector.shape_cast %58 : vector<4x8x16xf32> to vector<32x16xf32>
    %60 = arith.truncf %59 : vector<32x16xf32> to vector<32x16xbf16>
    %c0_19 = arith.constant 0 : index
    %c0_20 = arith.constant 0 : index
    %c0_21 = arith.constant 0 : index
    %61 = vector.load %arg4[%c0_19, %c0_20, %c0_21] : memref<1x32x32xbf16, #tpu.memory_space<vmem>>, vector<1x32x32xbf16>
    %62 = vector.shape_cast %61 : vector<1x32x32xbf16> to vector<32x32xbf16>
    %cst_22 = arith.constant dense<0.000000e+00> : vector<16x32xf32>
    %63 = tpu.matmul %60, %62, %cst_22 {dimension_numbers = #tpu.dot_dimension_numbers<[0], [0], [1], [1], [0, 1, 1, 1], [], []>} : vector<32x16xbf16>, vector<32x32xbf16>, vector<16x32xf32> -> vector<16x32xf32>
    %c0_23 = arith.constant 0 : index
    %c0_24 = arith.constant 0 : index
    %c0_25 = arith.constant 0 : index
    %64 = vector.load %arg5[%c0_23, %c0_24, %c0_25] : memref<1x1x32xf32, #tpu.memory_space<vmem>>, vector<1x1x32xf32>
    %65 = vector.shape_cast %64 : vector<1x1x32xf32> to vector<1x32xf32>
    %66 = vector.broadcast %65 : vector<1x32xf32> to vector<16x32xf32>
    %67 = arith.addf %63, %66 : vector<16x32xf32>
    %68 = arith.addf %3, %67 : vector<16x32xf32>
    %c0_26 = arith.constant 0 : index
    %c0_27 = arith.constant 0 : index
    %c0_28 = arith.constant 0 : index
    %69 = vector.load %arg6[%c0_26, %c0_27, %c0_28] : memref<1x1x32xf32, #tpu.memory_space<vmem>>, vector<1x1x32xf32>
    %70 = vector.shape_cast %69 : vector<1x1x32xf32> to vector<1x32xf32>
    %c0_29 = arith.constant 0 : index
    %c0_30 = arith.constant 0 : index
    %c0_31 = arith.constant 0 : index
    %71 = vector.load %arg7[%c0_29, %c0_30, %c0_31] : memref<1x1x32xf32, #tpu.memory_space<vmem>>, vector<1x1x32xf32>
    %72 = vector.shape_cast %71 : vector<1x1x32xf32> to vector<1x32xf32>
    %cst_32 = arith.constant dense<0.000000e+00> : vector<16xf32>
    %73 = vector.multi_reduction <add>, %68, %cst_32 [1] : vector<16x32xf32> to vector<16xf32>
    %74 = vector.shape_cast %73 : vector<16xf32> to vector<16x1xf32>
    %cst_33 = arith.constant 3.200000e+01 : f32
    %75 = vector.broadcast %cst_33 : f32 to vector<16x1xf32>
    %76 = arith.divf %74, %75 : vector<16x1xf32>
    %77 = vector.broadcast %76 : vector<16x1xf32> to vector<16x32xf32>
    %78 = arith.subf %68, %77 : vector<16x32xf32>
    %79 = arith.mulf %78, %78 : vector<16x32xf32>
    %cst_34 = arith.constant dense<0.000000e+00> : vector<16xf32>
    %80 = vector.multi_reduction <add>, %79, %cst_34 [1] : vector<16x32xf32> to vector<16xf32>
    %81 = vector.shape_cast %80 : vector<16xf32> to vector<16x1xf32>
    %cst_35 = arith.constant 3.200000e+01 : f32
    %82 = vector.broadcast %cst_35 : f32 to vector<16x1xf32>
    %83 = arith.divf %81, %82 : vector<16x1xf32>
    %84 = vector.broadcast %76 : vector<16x1xf32> to vector<16x32xf32>
    %85 = arith.subf %68, %84 : vector<16x32xf32>
    %cst_36 = arith.constant 9.99999974E-6 : f32
    %86 = vector.broadcast %cst_36 : f32 to vector<16x1xf32>
    %87 = arith.addf %83, %86 : vector<16x1xf32>
    %88 = math.rsqrt %87 : vector<16x1xf32>
    %89 = vector.broadcast %88 : vector<16x1xf32> to vector<16x32xf32>
    %90 = arith.mulf %85, %89 : vector<16x32xf32>
    %91 = vector.broadcast %70 : vector<1x32xf32> to vector<16x32xf32>
    %92 = arith.mulf %90, %91 : vector<16x32xf32>
    %93 = vector.broadcast %72 : vector<1x32xf32> to vector<16x32xf32>
    %94 = arith.addf %92, %93 : vector<16x32xf32>
    %95 = arith.truncf %94 : vector<16x32xf32> to vector<16x32xbf16>
    %c0_37 = arith.constant 0 : index
    %c0_38 = arith.constant 0 : index
    %c0_39 = arith.constant 0 : index
    %96 = vector.load %arg8[%c0_37, %c0_38, %c0_39] : memref<1x32x2048xbf16, #tpu.memory_space<vmem>>, vector<1x32x2048xbf16>
    %97 = vector.shape_cast %96 : vector<1x32x2048xbf16> to vector<32x2048xbf16>
    %cst_40 = arith.constant dense<0.000000e+00> : vector<16x2048xf32>
    %98 = tpu.matmul %95, %97, %cst_40 {dimension_numbers = #tpu.dot_dimension_numbers<[1], [0], [0], [1], [0, 0, 1, 1], [], []>} : vector<16x32xbf16>, vector<32x2048xbf16>, vector<16x2048xf32> -> vector<16x2048xf32>
    %c0_41 = arith.constant 0 : index
    %c0_42 = arith.constant 0 : index
    %c0_43 = arith.constant 0 : index
    %99 = vector.load %arg9[%c0_41, %c0_42, %c0_43] : memref<1x1x2048xf32, #tpu.memory_space<vmem>>, vector<1x1x2048xf32>
    %100 = vector.shape_cast %99 : vector<1x1x2048xf32> to vector<1x2048xf32>
    %101 = vector.broadcast %100 : vector<1x2048xf32> to vector<16x2048xf32>
    %102 = arith.addf %98, %101 : vector<16x2048xf32>
    %cst_44 = arith.constant 0.000000e+00 : f32
    %103 = vector.broadcast %cst_44 : f32 to vector<16x2048xf32>
    %104 = arith.maximumf %102, %103 : vector<16x2048xf32>
    %105 = arith.truncf %104 : vector<16x2048xf32> to vector<16x2048xbf16>
    %c0_45 = arith.constant 0 : index
    %c0_46 = arith.constant 0 : index
    %c0_47 = arith.constant 0 : index
    %106 = vector.load %arg10[%c0_45, %c0_46, %c0_47] : memref<1x2048x32xbf16, #tpu.memory_space<vmem>>, vector<1x2048x32xbf16>
    %107 = vector.shape_cast %106 : vector<1x2048x32xbf16> to vector<2048x32xbf16>
    %cst_48 = arith.constant dense<0.000000e+00> : vector<16x32xf32>
    %108 = tpu.matmul %105, %107, %cst_48 {dimension_numbers = #tpu.dot_dimension_numbers<[1], [0], [0], [1], [0, 0, 1, 1], [], []>} : vector<16x2048xbf16>, vector<2048x32xbf16>, vector<16x32xf32> -> vector<16x32xf32>
    %c0_49 = arith.constant 0 : index
    %c0_50 = arith.constant 0 : index
    %c0_51 = arith.constant 0 : index
    %109 = vector.load %arg11[%c0_49, %c0_50, %c0_51] : memref<1x1x32xf32, #tpu.memory_space<vmem>>, vector<1x1x32xf32>
    %110 = vector.shape_cast %109 : vector<1x1x32xf32> to vector<1x32xf32>
    %111 = vector.broadcast %110 : vector<1x32xf32> to vector<16x32xf32>
    %112 = arith.addf %108, %111 : vector<16x32xf32>
    %113 = arith.addf %94, %112 : vector<16x32xf32>
    %c0_52 = arith.constant 0 : index
    %c0_53 = arith.constant 0 : index
    %c0_54 = arith.constant 0 : index
    %114 = vector.load %arg12[%c0_52, %c0_53, %c0_54] : memref<1x1x32xf32, #tpu.memory_space<vmem>>, vector<1x1x32xf32>
    %115 = vector.shape_cast %114 : vector<1x1x32xf32> to vector<1x32xf32>
    %c0_55 = arith.constant 0 : index
    %c0_56 = arith.constant 0 : index
    %c0_57 = arith.constant 0 : index
    %116 = vector.load %arg13[%c0_55, %c0_56, %c0_57] : memref<1x1x32xf32, #tpu.memory_space<vmem>>, vector<1x1x32xf32>
    %117 = vector.shape_cast %116 : vector<1x1x32xf32> to vector<1x32xf32>
    %cst_58 = arith.constant dense<0.000000e+00> : vector<16xf32>
    %118 = vector.multi_reduction <add>, %113, %cst_58 [1] : vector<16x32xf32> to vector<16xf32>
    %119 = vector.shape_cast %118 : vector<16xf32> to vector<16x1xf32>
    %cst_59 = arith.constant 3.200000e+01 : f32
    %120 = vector.broadcast %cst_59 : f32 to vector<16x1xf32>
    %121 = arith.divf %119, %120 : vector<16x1xf32>
    %122 = vector.broadcast %121 : vector<16x1xf32> to vector<16x32xf32>
    %123 = arith.subf %113, %122 : vector<16x32xf32>
    %124 = arith.mulf %123, %123 : vector<16x32xf32>
    %cst_60 = arith.constant dense<0.000000e+00> : vector<16xf32>
    %125 = vector.multi_reduction <add>, %124, %cst_60 [1] : vector<16x32xf32> to vector<16xf32>
    %126 = vector.shape_cast %125 : vector<16xf32> to vector<16x1xf32>
    %cst_61 = arith.constant 3.200000e+01 : f32
    %127 = vector.broadcast %cst_61 : f32 to vector<16x1xf32>
    %128 = arith.divf %126, %127 : vector<16x1xf32>
    %129 = vector.broadcast %121 : vector<16x1xf32> to vector<16x32xf32>
    %130 = arith.subf %113, %129 : vector<16x32xf32>
    %cst_62 = arith.constant 9.99999974E-6 : f32
    %131 = vector.broadcast %cst_62 : f32 to vector<16x1xf32>
    %132 = arith.addf %128, %131 : vector<16x1xf32>
    %133 = math.rsqrt %132 : vector<16x1xf32>
    %134 = vector.broadcast %133 : vector<16x1xf32> to vector<16x32xf32>
    %135 = arith.mulf %130, %134 : vector<16x32xf32>
    %136 = vector.broadcast %115 : vector<1x32xf32> to vector<16x32xf32>
    %137 = arith.mulf %135, %136 : vector<16x32xf32>
    %138 = vector.broadcast %117 : vector<1x32xf32> to vector<16x32xf32>
    %139 = arith.addf %137, %138 : vector<16x32xf32>
    %c0_63 = arith.constant 0 : index
    %c0_64 = arith.constant 0 : index
    %140 = vector.load %arg17[%c0_63, %c0_64] : memref<16x32xf32, #tpu.memory_space<vmem>>, vector<16x32xf32>
    tpu.vector_store %arg17[%c0_63, %c0_64], %139 {strides = array<i32>} : memref<16x32xf32, #tpu.memory_space<vmem>>, vector<16x32xf32>,
    %c1_i32 = arith.constant 1 : i32
    %141 = arith.cmpi eq, %arg0, %c1_i32 : i32
    %142 = arith.extui %141 : i1 to i32
    %c0_i32_65 = arith.constant 0 : i32
    %143 = arith.cmpi ne, %142, %c0_i32_65 : i32
    scf.if %143 {
      %144 = arith.truncf %139 : vector<16x32xf32> to vector<16x32xbf16>
      %c0_66 = arith.constant 0 : index
      %c0_67 = arith.constant 0 : index
      %145 = vector.load %arg14[%c0_66, %c0_67] : memref<32x128xbf16, #tpu.memory_space<vmem>>, vector<32x128xbf16>
      %cst_68 = arith.constant dense<0.000000e+00> : vector<16x128xf32>
      %146 = tpu.matmul %144, %145, %cst_68 {dimension_numbers = #tpu.dot_dimension_numbers<[1], [0], [0], [1], [0, 0, 1, 1], [], []>} : vector<16x32xbf16>, vector<32x128xbf16>, vector<16x128xf32> -> vector<16x128xf32>
      %c0_69 = arith.constant 0 : index
      %c0_70 = arith.constant 0 : index
      %147 = vector.load %arg15[%c0_69, %c0_70] : memref<1x128xf32, #tpu.memory_space<vmem>>, vector<1x128xf32>
      %148 = vector.broadcast %147 : vector<1x128xf32> to vector<16x128xf32>
      %149 = arith.addf %146, %148 : vector<16x128xf32>
      %c0_71 = arith.constant 0 : index
      %c0_72 = arith.constant 0 : index
      %150 = vector.load %arg16[%c0_71, %c0_72] : memref<16x128xf32, #tpu.memory_space<vmem>>, vector<16x128xf32>
      tpu.vector_store %arg16[%c0_71, %c0_72], %149 {strides = array<i32>} : memref<16x128xf32, #tpu.memory_space<vmem>>, vector<16x128xf32>,
    } else {
    }
    return
  }
  func.func @transform_0(%arg0: i32) -> (i32, i32) {
    %c0_i32 = arith.constant 0 : i32
    %c0_i32_0 = arith.constant 0 : i32
    %c0_i32_1 = arith.constant 0 : i32
    return %c0_i32, %c0_i32_0 : i32, i32
  }
  func.func @transform_1(%arg0: i32) -> (i32, i32, i32) {
    %c0_i32 = arith.constant 0 : i32
    %c0_i32_0 = arith.constant 0 : i32
    %c0_i32_1 = arith.constant 0 : i32
    return %arg0, %c0_i32, %c0_i32_0 : i32, i32, i32
  }
  func.func @transform_2(%arg0: i32) -> (i32, i32, i32) {
    %c0_i32 = arith.constant 0 : i32
    %c0_i32_0 = arith.constant 0 : i32
    %c0_i32_1 = arith.constant 0 : i32
    return %arg0, %c0_i32, %c0_i32_0 : i32, i32, i32
  }
  func.func @transform_3(%arg0: i32) -> (i32, i32, i32) {
    %c0_i32 = arith.constant 0 : i32
    %c0_i32_0 = arith.constant 0 : i32
    %c0_i32_1 = arith.constant 0 : i32
    return %arg0, %c0_i32, %c0_i32_0 : i32, i32, i32
  }
  func.func @transform_4(%arg0: i32) -> (i32, i32, i32) {
    %c0_i32 = arith.constant 0 : i32
    %c0_i32_0 = arith.constant 0 : i32
    %c0_i32_1 = arith.constant 0 : i32
    return %arg0, %c0_i32, %c0_i32_0 : i32, i32, i32
  }
  func.func @transform_5(%arg0: i32) -> (i32, i32, i32) {
    %c0_i32 = arith.constant 0 : i32
    %c0_i32_0 = arith.constant 0 : i32
    %c0_i32_1 = arith.constant 0 : i32
    return %arg0, %c0_i32, %c0_i32_0 : i32, i32, i32
  }
  func.func @transform_6(%arg0: i32) -> (i32, i32, i32) {
    %c0_i32 = arith.constant 0 : i32
    %c0_i32_0 = arith.constant 0 : i32
    %c0_i32_1 = arith.constant 0 : i32
    return %arg0, %c0_i32, %c0_i32_0 : i32, i32, i32
  }
  func.func @transform_7(%arg0: i32) -> (i32, i32, i32) {
    %c0_i32 = arith.constant 0 : i32
    %c0_i32_0 = arith.constant 0 : i32
    %c0_i32_1 = arith.constant 0 : i32
    return %arg0, %c0_i32, %c0_i32_0 : i32, i32, i32
  }
  func.func @transform_8(%arg0: i32) -> (i32, i32, i32) {
    %c0_i32 = arith.constant 0 : i32
    %c0_i32_0 = arith.constant 0 : i32
    %c0_i32_1 = arith.constant 0 : i32
    return %arg0, %c0_i32, %c0_i32_0 : i32, i32, i32
  }
  func.func @transform_9(%arg0: i32) -> (i32, i32, i32) {
    %c0_i32 = arith.constant 0 : i32
    %c0_i32_0 = arith.constant 0 : i32
    %c0_i32_1 = arith.constant 0 : i32
    return %arg0, %c0_i32, %c0_i32_0 : i32, i32, i32
  }
  func.func @transform_10(%arg0: i32) -> (i32, i32, i32) {
    %c0_i32 = arith.constant 0 : i32
    %c0_i32_0 = arith.constant 0 : i32
    %c0_i32_1 = arith.constant 0 : i32
    return %arg0, %c0_i32, %c0_i32_0 : i32, i32, i32
  }
  func.func @transform_11(%arg0: i32) -> (i32, i32, i32) {
    %c0_i32 = arith.constant 0 : i32
    %c0_i32_0 = arith.constant 0 : i32
    %c0_i32_1 = arith.constant 0 : i32
    return %arg0, %c0_i32, %c0_i32_0 : i32, i32, i32
  }
  func.func @transform_12(%arg0: i32) -> (i32, i32, i32) {
    %c0_i32 = arith.constant 0 : i32
    %c0_i32_0 = arith.constant 0 : i32
    %c0_i32_1 = arith.constant 0 : i32
    return %arg0, %c0_i32, %c0_i32_0 : i32, i32, i32
  }
  func.func @transform_13(%arg0: i32) -> (i32, i32) {
    %c0_i32 = arith.constant 0 : i32
    %c0_i32_0 = arith.constant 0 : i32
    %c0_i32_1 = arith.constant 0 : i32
    return %c0_i32, %c0_i32_0 : i32, i32
  }
  func.func @transform_14(%arg0: i32) -> (i32, i32) {
    %c0_i32 = arith.constant 0 : i32
    %c0_i32_0 = arith.constant 0 : i32
    %c0_i32_1 = arith.constant 0 : i32
    return %c0_i32, %c0_i32_0 : i32, i32
  }
  func.func @transform_15(%arg0: i32) -> (i32, i32) {
    %c0_i32 = arith.constant 0 : i32
    %c0_i32_0 = arith.constant 0 : i32
    %c0_i32_1 = arith.constant 0 : i32
    return %c0_i32, %c0_i32_0 : i32, i32
  }
}

</mosaic_0001>

<bundles_post_ra>
// kernel: tpu_custom_call.1
= control target key start
LH: loop header
LB: loop body
LE: loop exit
PB: predicated region body
PF: predicated region fallthrough
CT: control target
= control target key end

     0   :  { %s4816_s0 = inlined_call_operand.vmem [shape: bf16[16,32], index: 0, kind: input, shape index: {}]   ;;  %s4817_s1 = inlined_call_operand.vmem [shape: bf16[2,32,96], index: 1, kind: input, shape index: {}]   ;;  %s4818_s2 = inlined_call_operand.vmem [shape: f32[2,1,96], index: 2, kind: input, shape index: {}]   ;;  %s4819_s3 = inlined_call_operand.vmem [shape: bf16[2,32,32], index: 3, kind: input, shape index: {}]   ;;  %s4820_s4 = inlined_call_operand.vmem [shape: f32[2,1,32], index: 4, kind: input, shape index: {}]   ;;  %s4821_s5 = inlined_call_operand.vmem [shape: f32[2,1,32], index: 5, kind: input, shape index: {}]   ;;  %s4822_s6 = inlined_call_operand.vmem [shape: f32[2,1,32], index: 6, kind: input, shape index: {}]   ;;  %s4823_s7 = inlined_call_operand.vmem [shape: bf16[2,32,2048], index: 7, kind: input, shape index: {}]   ;;  %s4824_s8 = inlined_call_operand.vmem [shape: f32[2,1,2048], index: 8, kind: input, shape index: {}]   ;;  %s4825_s9 = inlined_call_operand.vmem [shape: bf16[2,2048,32], index: 9, kind: input, shape index: {}]   ;;  %s4826_s10 = inlined_call_operand.vmem [shape: f32[2,1,32], index: 10, kind: input, shape index: {}]   ;;  %s4827_s11 = inlined_call_operand.vmem [shape: f32[2,1,32], index: 11, kind: input, shape index: {}]   ;;  %s4828_s12 = inlined_call_operand.vmem [shape: f32[2,1,32], index: 12, kind: input, shape index: {}]   ;;  %s4829_s13 = inlined_call_operand.vmem [shape: bf16[32,128], index: 13, kind: input, shape index: {}]   ;;  %s4830_s14 = inlined_call_operand.vmem [shape: f32[1,128], index: 14, kind: input, shape index: {}]   ;;  %s4831_s15 = inlined_call_operand.hbm [shape: f32[16,128], index: 15, kind: output, shape index: {}]  }
   0x1   :  { %4834 = sst [smem:[#allocation7_spill]] %s4816_s0 }
   0x2   :  { %4835 = sst [smem:[#allocation8_spill]] %s4817_s1 }
   0x3   :  { %4836 = sst [smem:[#allocation9_spill]] %s4819_s3 }
   0x4   :  { %4837 = sst [smem:[#allocation10_spill]] %s4829_s13 }
   0x5   :  { %4838 = sst [smem:[#allocation11_spill]] %s4830_s14 }
   0x6   :  { %4839 = sst [smem:[#allocation12_spill]] %s4831_s15 }
   0x7   :  { %20 = vsyncpa [#allocation4], 0  ;;  %s4353_s18 = smov 0  }
   0x8 LB: > { %4840 = sst [smem:[#allocation6_spill]] %s4266_s18  ;;  %s4359_s19 = sadd.s32 4294967295, %s4266_s18   ;;  %s4266_s18 = sphi %s4353_s18, %s26_s18  }
   0x9   : > { %p3273_p0 = scmp.ge.s32.totalorder %s4266_s18, 1  ;;  %p528_p1 = scmp.lt.s32.totalorder %s4266_s18, 3 }
   0xb   : > { %p529_p2 = pnand %p3273_p0, %p528_p1 }
   0xc   : > { %p611_p3 = scmp.lt.s32.totalorder (!%p529_p2), %s4359_s19, 1  ;;  %s4841_s1 = sld [smem:[#allocation8_spill]] (!%p529_p2) }
   0xd   : > { %532 = sbr.rel (%p529_p2) target bundleno = 2437 (0x985), region = 80  ;;  %s4842_s3 = sld [smem:[#allocation9_spill]] (!%p529_p2) }
   0xe   : > { %p3283_p4 = scmp.ne.s32.totalorder (!%p529_p2), %s4359_s19, 0 }
  0x12   : > { %s4365_s20 = scalar_select %p611_p3, %s4359_s19, 1 }
  0x13   : > { %s4843_s18 = sld [smem:[#allocation7_spill]] (!%p3283_p4) }
  0x14   : > { %s3980_s21 = sshll.u32 %s4365_s20, 4  ;;  %s3982_s24 = sshll.u32 %s4365_s20, 8 }
  0x15   : > { %s615_s27 = scalar_lea.vmem %s4841_s1, %s3980_s21  ;;  %s4378_s30 = scalar_lea.vmem %s4842_s3, %s3980_s21 }
  0x16   : > { %s4396_s1 = scalar_lea.vmem %s4823_s7, %s3982_s24  ;;  %s4401_s3 = scalar_lea.vmem %s4824_s8, %s3980_s21 }
  0x17   : > { %s3983_s16 = sshll.u32 %s4365_s20, 10  ;;  %s649_s14 = scalar_lea.vmem %s4826_s10, %s4365_s20 }
  0x18   : > { %s4411_s0 = scalar_lea.vmem %s4825_s9, %s3983_s16  ;;  %s652_s24 = scalar_lea.vmem %s4827_s11, %s4365_s20 }
  0x19   : > { %s655_s28 = scalar_lea.vmem %s4828_s12, %s4365_s20  ;;  %660 = sbr.rel (%p3283_p4) target bundleno = 35 (0x23), region = 84 }
  0x1e   : > { %v4151_v0 = vld [vmem:[%s4843_s18] sm:$0xff]   ;;  %vm665_vm0 = vcmask 261120  }
  0x1f   : > { %v4152_v1 = vunpack.c.l.bf16 %v4151_v0  ;;  %v4153_v2 = vunpack.c.h.bf16 %v4151_v0 }
  0x21   : > { %666 = vst.msk [vmem:[#allocation2] sm:$0xff] %vm665_vm0, %v4152_v1 }
  0x22   : > { %667 = vst.msk [vmem:[#allocation2 + $0x8] sm:$0xff] %vm665_vm0, %v4153_v2 }
  0x23 PF: > { %v3985_v3 = vld [vmem:[%s615_s27 + $0x8] sm:$0xff]  ;;  %v3984_v4 = vld [vmem:[%s615_s27] sm:$0xff]  ;;  %vm691_vm1 = vcmask 261120   ;;  %s4844_s16 = scalar_lea.vmem %s4818_s2, %s4365_s20  ;;  %vm794_vm2 = vcmask 1043456   ;;  %vm790_vm3 = vcmask 64512   ;;  %v753_v37 = vlaneseq  ;;  %s4846_s25 = scalar_lea.vmem %s4821_s5, %s4365_s20 }
  0x24   : > { %701 = vmatpush.bf16.msra.mxu0 %v3985_v3  ;;  %v4178_v8 = vld [vmem:[%s4844_s16] ss:$0 sm:$0xff]  ;;  %v4268_v53 = vmov -1e+30   ;;  %vm936_vm5 = vcmask 130048   ;;  %s4847_s29 = scalar_lea.vmem %s4822_s6, %s4365_s20  ;;  %p3966_p5 = scmp.ne.s32.totalorder %s4359_s19, 1 }
  0x25   : > { %v754_v38 = vshrl.u32 %v753_v37, 7  ;;  %v759_v39 = vand.u32 127, %v753_v37 }
  0x27   : > { %v756_v40 = vcvt.s32.f32 %v754_v38  ;;  %v760_v41 = vcvt.s32.f32 %v759_v39  ;;  %v755_v44 = vadd.s32 8, %v754_v38 }
  0x28   : > { %v4425_v5 = vld [vmem:[#allocation2] sm:$0xff]  ;;  %702 = vmatpush.bf16.msra.mxu0 %v3984_v4 }
  0x29   : > { %v4427_v6 = vld [vmem:[#allocation2 + $0x8] sm:$0xff]  ;;  %v761_v42 = vadd.f32 0.5, %v756_v40  ;;  %v767_v43 = vadd.f32 0.5, %v760_v41  ;;  %v757_v47 = vcvt.s32.f32 %v755_v44 }
  0x2a   : > { %v670_v7 = vpack.c.bf16 %v4427_v6, %v4425_v5 }
  0x2b   : > { %v763_v45 = vmul.f32 0.125, %v761_v42  ;;  %v768_v46 = vmul.f32 0.125, %v767_v43  ;;  %v762_v50 = vadd.f32 0.5, %v757_v47 }
  0x2c   : > { %3292 = vmatmul.msk.bf16.vlgmr.msra.gmra.mxu0 %vm691_vm1, %v670_v7 }
  0x2d   : > { %v765_v48 = vfloor.f32 %v763_v45  ;;  %v769_v49 = vfloor.f32 %v768_v46  ;;  %v764_v51 = vmul.f32 0.125, %v762_v50 }
  0x2f   : > { %vm770_vm4 = vcmp.eq.f32.partialorder %v765_v48, %v769_v49  ;;  %v766_v56 = vfloor.f32 %v764_v51 }
  0x30   : > { %v772_v54 = vsel %vm770_vm4, 0.0, %v4268_v53 }
  0x31   : > { %vm771_vm6 = vcmp.eq.f32.partialorder %v766_v56, %v769_v49 }
  0x32   : > { %v773_v0 = vsel %vm771_vm6, 0.0, %v4268_v53 }
  0xa9   : > { %v704_v9 = vpop.f32.mrf.mxu0 }
  0xaa   : > { %v705_v10 = vadd.f32 %v4178_v8, %v704_v9 }
  0xac   : > { %709 = vxpose.xlu0.b32.start [1/2] (short) (narrow) %v705_v10, 96 }
  0xb1   : > { %v706_v11 = vpop.f32.mrf.mxu0 }
  0xb2   : > { %v707_v12 = vadd.f32 %v4178_v8, %v706_v11 }
  0xb4   : > { %710 = vxpose.xlu0.b32.end [2/2] (short) (narrow) %v707_v12, 96 }
 0x150   : > { %v725_v13 = vpop.trf.xlu0 }
 0x151   : > { %v741_v15 = vpack.c.bf16 %v725_v13, %v725_v13 }
 0x158   : > { %v726_v14 = vpop.trf.xlu0 }
 0x159   : > { %v742_v16 = vpack.c.bf16 %v726_v14, %v726_v14 }
 0x15b   : > { %4175 = vxpose.binary.xlu1.c.b16.start.end [1/2] (short) (narrow) %v741_v15, %v742_v16, 16 }
 0x160   : > { %v727_v17 = vpop.trf.xlu0 }
 0x161   : > { %v743_v18 = vpack.c.bf16 %v727_v17, %v727_v17 }
 0x168   : > { %v728_v19 = vpop.trf.xlu0 }
 0x169   : > { %v744_v20 = vpack.c.bf16 %v728_v19, %v728_v19 }
 0x16b   : > { %848 = vxpose.xlu1.c.b16.start.end [1/1] (short) (narrow) %v743_v18, 16  ;;  %884 = vxpose.xlu2.c.b16.start.end [1/1] (short) (narrow) %v744_v20, 16 }
 0x170   : > { %v729_v21 = vpop.trf.xlu0 }
 0x171   : > { %v745_v25 = vpack.c.bf16 %v729_v21, %v729_v21 }
 0x173   : > { %v796_v26 = vsel %vm794_vm2, %v745_v25, 0 }
 0x174   : > { %805 = vmatpush.bf16.msra.mxu1 %v796_v26 }
 0x178   : > { %v730_v22 = vpop.trf.xlu0 }
 0x179   : > { %v746_v23 = vpack.c.bf16 %v730_v22, %v730_v22 }
 0x17b   : > { %v832_v24 = vsel %vm794_vm2, %v746_v23, 0 }
 0x17c   : > { %841 = vmatpush.bf16.msra.mxu2 %v832_v24 }
 0x180   : > { %v731_v27 = vpop.trf.xlu0 }
 0x181   : > { %v747_v28 = vpack.c.bf16 %v731_v27, %v731_v27 }
 0x183   : > { %v868_v29 = vsel %vm794_vm2, %v747_v28, 0 }
 0x184   : > { %877 = vmatpush.bf16.msra.mxu3 %v868_v29 }
 0x188   : > { %v732_v30 = vpop.trf.xlu0 }
 0x189   : > { %v748_v31 = vpack.c.bf16 %v732_v30, %v732_v30 }
 0x18b   : > { %v904_v32 = vsel %vm794_vm2, %v748_v31, 0 }
 0x18c   : > { %913 = vmatpush.bf16.msrb.mxu1 %v904_v32 }
 0x190   : > { %v4445_v26 = vpop.trf.xlu0 }
 0x198   : > { %v4447_v27 = vpop.trf.xlu0 }
 0x1a0   : > { %v4449_v28 = vpop.trf.xlu0 }
 0x1a8   : > { %v4451_v30 = vpop.trf.xlu0 }
 0x207   : > { %v4176_v33 = vpop.trf.xlu1 }
 0x208   : > { %3294 = vmatmul.msk.bf16.vlgmr.msra.gmra.mxu2 %vm790_vm3, %v4176_v33 }
 0x20c   : > { %v892_v36 = vpop.trf.xlu2 }
 0x20f   : > { %v4177_v34 = vpop.trf.xlu1 }
 0x210   : > { %3293 = vmatmul.msk.bf16.vlgmr.msra.gmra.mxu1 %vm790_vm3, %v4177_v34 }
 0x217   : > { %v856_v35 = vpop.trf.xlu1 }
 0x218   : > { %3295 = vmatmul.msk.bf16.vlgmr.msra.gmra.mxu3 %vm790_vm3, %v856_v35 }
 0x220   : > { %3296 = vmatmul.msk.bf16.vlgmr.msrb.gmra.mxu1 %vm790_vm3, %v892_v36 }
 0x28b   : > { %v843_v52 = vpop.f32.mrf.mxu2 }
 0x28c   : > { %v922_v55 = vmul.f32 0.35355338, %v843_v52 }
 0x28d   : > { %v807_v57 = vpop.f32.mrf.mxu1 }
 0x28e   : > { %v920_v58 = vmul.f32 0.35355338, %v807_v57  ;;  %v930_v59 = vadd.f32 %v922_v55, %v772_v54 }
 0x290   : > { %v943_v60 = vsel %vm936_vm5, %v930_v59, -inf  ;;  %v928_v61 = vadd.f32 %v920_v58, %v772_v54 }
 0x291   : > { %944 = vmax.xlane.f32.xlu1 %v943_v60 }
 0x292   : > { %v937_v62 = vsel %vm936_vm5, %v928_v61, -inf }
 0x293   : > { %938 = vmax.xlane.f32.xlu2 %v937_v62  ;;  %v845_v63 = vpop.f32.mrf.mxu2 }
 0x294   : > { %v923_v1 = vmul.f32 0.35355338, %v845_v63 }
 0x295   : > { %v809_v2 = vpop.f32.mrf.mxu1 }
 0x296   : > { %v921_v3 = vmul.f32 0.35355338, %v809_v2  ;;  %v931_v4 = vadd.f32 %v923_v1, %v773_v0 }
 0x298   : > { %v946_v7 = vsel %vm936_vm5, %v931_v4, -inf  ;;  %v929_v8 = vadd.f32 %v921_v3, %v773_v0 }
 0x299   : > { %947 = vmax.xlane.f32.xlu1 %v946_v7 }
 0x29a   : > { %v940_v9 = vsel %vm936_vm5, %v929_v8, -inf }
 0x29b   : > { %941 = vmax.xlane.f32.xlu0 %v940_v9  ;;  %v879_v10 = vpop.f32.mrf.mxu3 }
 0x29c   : > { %v924_v11 = vmul.f32 0.35355338, %v879_v10 }
 0x29d   : > { %v915_v12 = vpop.f32.mrf.mxu1 }
 0x29e   : > { %v932_v13 = vadd.f32 %v924_v11, %v772_v54  ;;  %v926_v14 = vmul.f32 0.35355338, %v915_v12 }
 0x2a0   : > { %v949_v15 = vsel %vm936_vm5, %v932_v13, -inf  ;;  %v934_v16 = vadd.f32 %v926_v14, %v772_v54 }
 0x2a1   : > { %950 = vmax.xlane.f32.xlu2 %v949_v15 }
 0x2a2   : > { %v955_v21 = vsel %vm936_vm5, %v934_v16, -inf }
 0x2a3   : > { %v881_v17 = vpop.f32.mrf.mxu3 }
 0x2a4   : > { %v925_v18 = vmul.f32 0.35355338, %v881_v17 }
 0x2a5   : > { %v917_v19 = vpop.f32.mrf.mxu1 }
 0x2a6   : > { %v933_v20 = vadd.f32 %v925_v18, %v773_v0  ;;  %v927_v22 = vmul.f32 0.35355338, %v917_v19 }
 0x2a8   : > { %v952_v23 = vsel %vm936_vm5, %v933_v20, -inf  ;;  %v935_v24 = vadd.f32 %v927_v22, %v773_v0 }
 0x2a9   : > { %953 = vmax.xlane.f32.xlu1 %v952_v23  ;;  %956 = vmax.xlane.f32.xlu2 %v955_v21 }
 0x2aa   : > { %v958_v25 = vsel %vm936_vm5, %v935_v24, -inf }
 0x2b1   : > { %959 = vmax.xlane.f32.xlu1 %v958_v25 }
 0x304   : > { %v945_v29 = vpop.xlane.xlu1 %944 }
 0x305   : > { %v963_v33 = vsub.f32 %v930_v59, %v945_v29 }
 0x306   : > { %v939_v31 = vpop.xlane.xlu2 %938 }
 0x307   : > { %v961_v32 = vsub.f32 %v928_v61, %v939_v31  ;;  %v973_v35 = vmul.f32 1.442695, %v963_v33 }
 0x309   : > { %v969_v34 = vmul.f32 1.442695, %v961_v32 }
 0x30b   : > { %4185 = vpow2.f32 %v969_v34 }
 0x30c   : > { %v948_v36 = vpop.xlane.xlu1 %947  ;;  %4187 = vpow2.f32 %v973_v35 }
 0x30d   : > { %v964_v39 = vsub.f32 %v931_v4, %v948_v36 }
 0x30e   : > { %v942_v37 = vpop.xlane.xlu0 %941 }
 0x30f   : > { %v962_v38 = vsub.f32 %v929_v8, %v942_v37  ;;  %v975_v43 = vmul.f32 1.442695, %v964_v39  ;;  %v749_v39 = vpack.c.bf16 %v4445_v26, %v4445_v26  ;;  %v750_v26 = vpack.c.bf16 %v4447_v27, %v4447_v27 }
 0x310   : > { %v752_v27 = vpack.c.bf16 %v4451_v30, %v4451_v30 }
 0x311   : > { %v4186_v40 = vpop.eup %4185  ;;  %v971_v41 = vmul.f32 1.442695, %v962_v38 }
 0x312   : > { %v985_v42 = vsel %vm936_vm5, %v4186_v40, 0.0  ;;  %v4188_v46 = vpop.eup %4187 }
 0x313   : > { %4189 = vpow2.f32 %v971_v41  ;;  %986 = vadd.xlane.f32.xlu2 %v985_v42  ;;  %v991_v49 = vsel %vm936_vm5, %v4188_v46, 0.0 }
 0x314   : > { %v951_v44 = vpop.xlane.xlu2 %950  ;;  %4191 = vpow2.f32 %v975_v43 }
 0x315   : > { %v965_v45 = vsub.f32 %v932_v13, %v951_v44 }
 0x317   : > { %v977_v47 = vmul.f32 1.442695, %v965_v45 }
 0x319   : > { %v4190_v48 = vpop.eup %4189  ;;  %4193 = vpow2.f32 %v977_v47 }
 0x31a   : > { %v988_v50 = vsel %vm936_vm5, %v4190_v48, 0.0  ;;  %v4192_v55 = vpop.eup %4191 }
 0x31b   : > { %992 = vadd.xlane.f32.xlu2 %v991_v49  ;;  %989 = vadd.xlane.f32.xlu1 %v988_v50  ;;  %v994_v60 = vsel %vm936_vm5, %v4192_v55, 0.0 }
 0x31c   : > { %v954_v51 = vpop.xlane.xlu1 %953  ;;  %v957_v52 = vpop.xlane.xlu2 %956 }
 0x31d   : > { %v966_v53 = vsub.f32 %v933_v20, %v954_v51  ;;  %v967_v54 = vsub.f32 %v934_v16, %v957_v52 }
 0x31f   : > { %v4194_v56 = vpop.eup %4193  ;;  %v979_v57 = vmul.f32 1.442695, %v966_v53  ;;  %v981_v58 = vmul.f32 1.442695, %v967_v54 }
 0x320   : > { %v997_v59 = vsel %vm936_vm5, %v4194_v56, 0.0 }
 0x321   : > { %4195 = vpow2.f32 %v979_v57 }
 0x322   : > { %4197 = vpow2.f32 %v981_v58 }
 0x323   : > { %998 = vadd.xlane.f32.xlu2 %v997_v59  ;;  %995 = vadd.xlane.f32.xlu1 %v994_v60  ;;  %v751_v60 = vpack.c.bf16 %v4449_v28, %v4449_v28 }
 0x324   : > { %v960_v61 = vpop.xlane.xlu1 %959 }
 0x325   : > { %v968_v62 = vsub.f32 %v935_v24, %v960_v61 }
 0x327   : > { %v4196_v63 = vpop.eup %4195  ;;  %v983_v0 = vmul.f32 1.442695, %v968_v62  ;;  %v3987_v62 = vld [vmem:[%s4378_s30 + $0x8] sm:$0xff] }
 0x328   : > { %v4198_v1 = vpop.eup %4197  ;;  %v1000_v3 = vsel %vm936_vm5, %v4196_v63, 0.0 }
 0x329   : > { %4199 = vpow2.f32 %v983_v0  ;;  %v1003_v2 = vsel %vm936_vm5, %v4198_v1, 0.0 }
 0x32b   : > { %1004 = vadd.xlane.f32.xlu2 %v1003_v2  ;;  %1001 = vadd.xlane.f32.xlu1 %v1000_v3 }
 0x32f   : > { %v4200_v4 = vpop.eup %4199 }
 0x330   : > { %v1006_v7 = vsel %vm936_vm5, %v4200_v4, 0.0 }
 0x333   : > { %1007 = vadd.xlane.f32.xlu1 %v1006_v7 }
 0x386   : > { %v987_v8 = vpop.xlane.xlu2 %986 }
 0x387   : > { %4201 = vrcp.f32 %v987_v8 }
 0x38d   : > { %v4202_v11 = vpop.eup %4201 }
 0x38e   : > { %v993_v9 = vpop.xlane.xlu2 %992  ;;  %v990_v10 = vpop.xlane.xlu1 %989  ;;  %v1017_v12 = vmul.f32 %v4202_v11, %v4186_v40 }
 0x38f   : > { %4203 = vrcp.f32 %v990_v10 }
 0x390   : > { %4205 = vrcp.f32 %v993_v9  ;;  %v1025_v17 = vpack.c.bf16 %v1017_v12, %v1017_v12 }
 0x392   : > { %v1035_v20 = vunpack.c.l.b16 %v1025_v17 }
 0x395   : > { %v4204_v13 = vpop.eup %4203 }
 0x396   : > { %v999_v14 = vpop.xlane.xlu2 %998  ;;  %v996_v15 = vpop.xlane.xlu1 %995  ;;  %v1018_v16 = vmul.f32 %v4204_v13, %v4190_v48 }
 0x397   : > { %v4206_v18 = vpop.eup %4205  ;;  %4207 = vrcp.f32 %v996_v15 }
 0x398   : > { %v1026_v19 = vpack.c.bf16 %v1018_v16, %v1018_v16  ;;  %4209 = vrcp.f32 %v999_v14  ;;  %v1019_v22 = vmul.f32 %v4206_v18, %v4188_v46 }
 0x39a   : > { %v1036_v21 = vunpack.c.l.b16 %v1026_v19  ;;  %v1027_v33 = vpack.c.bf16 %v1019_v22, %v1019_v22 }
 0x39c   : > { %v1037_v23 = vpack.c.b16 %v1036_v21, %v1035_v20  ;;  %v1059_v36 = vunpack.c.l.b16 %v1027_v33  ;;  %v4269_v20 = vmov 32.0  }
 0x39d   : > { %v4208_v24 = vpop.eup %4207 }
 0x39e   : > { %v1005_v25 = vpop.xlane.xlu2 %1004  ;;  %v1002_v29 = vpop.xlane.xlu1 %1001  ;;  %v1042_v31 = vsel %vm936_vm5, %v1037_v23, 0  ;;  %v1020_v32 = vmul.f32 %v4208_v24, %v4192_v55 }
 0x39f   : > { %v4210_v34 = vpop.eup %4209  ;;  %4211 = vrcp.f32 %v1002_v29  ;;  %1051 = vmatpush.bf16.xpose.msrb.mxu2 %v1042_v31 }
 0x3a0   : > { %4213 = vrcp.f32 %v1005_v25  ;;  %v1028_v35 = vpack.c.bf16 %v1020_v32, %v1020_v32  ;;  %v1021_v38 = vmul.f32 %v4210_v34, %v4194_v56 }
 0x3a2   : > { %v1060_v37 = vunpack.c.l.b16 %v1028_v35  ;;  %v1029_v46 = vpack.c.bf16 %v1021_v38, %v1021_v38 }
 0x3a4   : > { %v1061_v40 = vpack.c.b16 %v1060_v37, %v1059_v36  ;;  %v1083_v49 = vunpack.c.l.b16 %v1029_v46 }
 0x3a5   : > { %v4212_v41 = vpop.eup %4211 }
 0x3a6   : > { %v1008_v42 = vpop.xlane.xlu1 %1007  ;;  %v4214_v43 = vpop.eup %4213  ;;  %3297 = vmatmul.msk.bf16.vlgmr.msrb.gmra.mxu2 %vm936_vm5, %v749_v39  ;;  %v1066_v44 = vsel %vm936_vm5, %v1061_v40, 0  ;;  %v1022_v45 = vmul.f32 %v4212_v41, %v4196_v63  ;;  %v3986_v63 = vld [vmem:[%s4378_s30] sm:$0xff]  ;;  %s4845_s30 = scalar_lea.vmem %s4820_s4, %s4365_s20 }
 0x3a7   : > { %4215 = vrcp.f32 %v1008_v42  ;;  %1075 = vmatpush.bf16.xpose.msrb.mxu3 %v1066_v44  ;;  %v1023_v48 = vmul.f32 %v4214_v43, %v4198_v1  ;;  %1176 = vmatpush.bf16.msra.mxu2 %v3987_v62  ;;  %v4179_v11 = vld [vmem:[%s4845_s30] ss:$0 sm:$0xff]  ;;  %v4004_v41 = vld [vmem:[%s4396_s1 + $0x84] sm:$0xf]  ;;  %v3384_v44 = vld [vmem:[%s4396_s1 + $0x88] sm:$0xf] }
 0x3a8   : > { %v1030_v47 = vpack.c.bf16 %v1022_v45, %v1022_v45  ;;  %4217 = vrcp.f32 %v4269_v20  ;;  %v3376_v39 = vld [vmem:[%s4396_s1 + $0x80] sm:$0xf]  ;;  %v3378_v43 = vld [vmem:[%s4396_s1 + $0xc0] sm:$0xf0]  ;;  %v4013_v45 = vld [vmem:[%s4396_s1 + $0xc4] sm:$0xf0] }
 0x3a9   : > { %v1031_v54 = vpack.c.bf16 %v1023_v48, %v1023_v48  ;;  %v4012_v40 = vld [vmem:[%s4396_s1 + $0xbc] sm:$0xf0]  ;;  %v3381_v46 = vor.u32 %v4004_v41, %v3378_v43  ;;  %v4005_v48 = vld [vmem:[%s4396_s1 + $0x8c] sm:$0xf]  ;;  %s4849_s30 = sld [smem:[#allocation11_spill]] (!%p3966_p5) }
 0x3aa   : > { %v1084_v50 = vunpack.c.l.b16 %v1030_v47  ;;  %v3377_v42 = vor.u32 %v4012_v40, %v3376_v39  ;;  %v3385_v47 = vor.u32 %v4013_v45, %v3384_v44  ;;  %v3322_v62 = vld [vmem:[%s4396_s1 + $0x48] sm:$0xf0]  ;;  %v4180_v44 = vld [vmem:[%s4846_s25] ss:$0 sm:$0xff] }
 0x3ab   : > { %v1107_v57 = vunpack.c.l.b16 %v1031_v54  ;;  %1177 = vmatpush.bf16.msra.mxu2 %v3986_v63  ;;  %v3988_v54 = vld [vmem:[%s4396_s1 + $0x4] sm:$0xf] }
 0x3ac   : > { %v1085_v52 = vpack.c.b16 %v1084_v50, %v1083_v49  ;;  %v3386_v49 = vld [vmem:[%s4396_s1 + $0xc8] sm:$0xf0] }
 0x3ad   : > { %v4216_v51 = vpop.eup %4215 }
 0x3ae   : > { %v1024_v53 = vmul.f32 %v4216_v51, %v4200_v4  ;;  %3298 = vmatmul.msk.bf16.vlgmr.msrb.gmra.mxu3 %vm936_vm5, %v750_v26  ;;  %v1090_v55 = vsel %vm936_vm5, %v1085_v52, 0  ;;  %v4218_v21 = vpop.eup %4217  ;;  %v3389_v51 = vor.u32 %v4005_v48, %v3386_v49  ;;  %v3312_v52 = vld [vmem:[%s4396_s1] sm:$0xf] }
 0x3af   : > { %1099 = vmatpush.bf16.xpose.msrb.mxu0 %v1090_v55  ;;  %v1195_v22 = vmul.f32 32.0, %v4218_v21  ;;  %vm1199_vm7 = vweird.f32 %v4218_v21  ;;  %1487 = vmatpush.bf16.msra.mxu3 %v3377_v42  ;;  %v4181_v48 = vld [vmem:[%s4847_s29] ss:$0 sm:$0xff] }
 0x3b0   : > { %v1032_v56 = vpack.c.bf16 %v1024_v53, %v1024_v53  ;;  %v3996_v53 = vld [vmem:[%s4396_s1 + $0x3c] sm:$0xf0]  ;;  %1529 = vmatpush.bf16.msrb.mxu2 %v3389_v51 }
 0x3b1   : > { %v1196_v23 = vsub.f32 1.0, %v1195_v22  ;;  %v3313_v55 = vor.u32 %v3996_v53, %v3312_v52  ;;  %v3336_v22 = vld [vmem:[%s4396_s1 + $0x18] sm:$0xf]  ;;  %v4008_v52 = vld [vmem:[%s4396_s1 + $0xa4] sm:$0xf] }
 0x3b2   : > { %v1108_v58 = vunpack.c.l.b16 %v1032_v56  ;;  %v3314_v56 = vld [vmem:[%s4396_s1 + $0x40] sm:$0xf0] }
 0x3b3   : > { %v1197_v24 = vmul.f32 %v4218_v21, %v1196_v23  ;;  %1488 = vmatpush.bf16.msra.mxu3 %v3313_v55  ;;  %v3999_v23 = vld [vmem:[%s4396_s1 + $0x54] sm:$0xf0]  ;;  %v3410_v53 = vld [vmem:[%s4396_s1 + $0xe0] sm:$0xf0] }
 0x3b4   : > { %v1109_v59 = vpack.c.b16 %v1108_v58, %v1107_v57  ;;  %v3320_v57 = vld [vmem:[%s4396_s1 + $0x8] sm:$0xf] }
 0x3b5   : > { %v1198_v25 = vadd.f32 %v4218_v21, %v1197_v24  ;;  %v3997_v58 = vld [vmem:[%s4396_s1 + $0x44] sm:$0xf0] }
 0x3b6   : > { %v1114_v61 = vsel %vm936_vm5, %v1109_v59, 0  ;;  %3299 = vmatmul.msk.bf16.vlgmr.msrb.gmra.mxu0 %vm936_vm5, %v751_v60  ;;  %v3317_v60 = vor.u32 %v3988_v54, %v3314_v56  ;;  %v3416_v54 = vld [vmem:[%s4396_s1 + $0xa8] sm:$0xf] }
 0x3b7   : > { %1123 = vmatpush.bf16.xpose.msra.mxu1 %v1114_v61  ;;  %1501 = vmatpush.bf16.msra.mxu0 %v3381_v46  ;;  %v3321_v61 = vor.u32 %v3997_v58, %v3320_v57  ;;  %v4017_v57 = vld [vmem:[%s4396_s1 + $0xe4] sm:$0xf0]  ;;  %v4009_v58 = vld [vmem:[%s4396_s1 + $0xac] sm:$0xf] }
 0x3bb   : > { %1502 = vmatpush.bf16.msra.mxu0 %v3317_v60 }
 0x3be   : > { %3300 = vmatmul.msk.bf16.vlgmr.msra.gmra.mxu1 %vm936_vm5, %v752_v27  ;;  %v3989_v27 = vld [vmem:[%s4396_s1 + $0xc] sm:$0xf] }
 0x3bf   : > { %1515 = vmatpush.bf16.msrb.mxu1 %v3385_v47  ;;  %v3325_v63 = vor.u32 %v3989_v27, %v3322_v62  ;;  %v3344_v27 = vld [vmem:[%s4396_s1 + $0x20] sm:$0xf] }
 0x3c0   : > { %v4000_v62 = vld [vmem:[%s4396_s1 + $0x5c] sm:$0xf0] }
 0x3c1   : > { %1530 = vmatpush.bf16.msrb.mxu2 %v3325_v63  ;;  %v3417_v63 = vor.u32 %v4017_v57, %v3416_v54  ;;  %v4031_v54 = vld [vmem:[%s4411_s0 + $0x58] sm:$0xff] }
 0x3c2   : > { %v4039_v57 = vld [vmem:[%s4411_s0 + $0x98] sm:$0xff] }
 0x3c3   : > { %1516 = vmatpush.bf16.msrb.mxu1 %v3321_v61  ;;  %v3413_v61 = vor.u32 %v4008_v52, %v3410_v53  ;;  %v4024_v52 = vld [vmem:[%s4411_s0 + $0x20] sm:$0xff] }
 0x3c4   : > { %v4048_v53 = vld [vmem:[%s4411_s0 + $0xe0] sm:$0xff] }
 0x429   : > { %v1053_v0 = vpop.f32.mrf.mxu2 }
 0x431   : > { %v1055_v1 = vpop.f32.mrf.mxu2  ;;  %v1077_v2 = vpop.f32.mrf.mxu3 }
 0x432   : > { %v1129_v3 = vpack.c.bf16 %v1077_v2, %v1053_v0  ;;  %v3392_v1 = vld [vmem:[%s4396_s1 + $0x90] sm:$0xf] }
 0x433   : > { %v1101_v28 = vpop.f32.mrf.mxu0  ;;  %v4014_v2 = vld [vmem:[%s4396_s1 + $0xcc] sm:$0xf0] }
 0x434   : > { %1139 = vxpose.xlu2.c.b16.start [1/2] (short) (narrow) %v1129_v3, 16  ;;  %v4006_v3 = vld [vmem:[%s4396_s1 + $0x94] sm:$0xf] }
 0x439   : > { %v1079_v4 = vpop.f32.mrf.mxu3 }
 0x43a   : > { %v3393_v4 = vor.u32 %v4014_v2, %v3392_v1  ;;  %v3992_v1 = vld [vmem:[%s4396_s1 + $0x24] sm:$0xf] }
 0x43b   : > { %v1125_v7 = vpop.f32.mrf.mxu1  ;;  %v1103_v8 = vpop.f32.mrf.mxu0  ;;  %v3346_v2 = vld [vmem:[%s4396_s1 + $0x60] sm:$0xf0] }
 0x43c   : > { %v1130_v9 = vpack.c.bf16 %v1125_v7, %v1101_v28  ;;  %v3394_v7 = vld [vmem:[%s4396_s1 + $0xd0] sm:$0xf0]  ;;  %v3400_v8 = vld [vmem:[%s4396_s1 + $0x98] sm:$0xf]  ;;  %1543 = vmatpush.bf16.msrb.mxu3 %v3393_v4  ;;  %v3993_v4 = vld [vmem:[%s4396_s1 + $0x2c] sm:$0xf] }
 0x443   : > { %v1127_v10 = vpop.f32.mrf.mxu1 }
 0x444   : > { %1140 = vxpose.xlu2.c.b16.end [2/2] (short) (narrow) %v1130_v9, 16  ;;  %v4015_v9 = vld [vmem:[%s4396_s1 + $0xd4] sm:$0xf0]  ;;  %v3397_v10 = vor.u32 %v4006_v3, %v3394_v7  ;;  %v3352_v3 = vld [vmem:[%s4396_s1 + $0x28] sm:$0xf] }
 0x445   : > { %v3354_v7 = vld [vmem:[%s4396_s1 + $0x68] sm:$0xf0] }
 0x446   : > { %1557 = vmatpush.bf16.msrb.mxu0 %v3397_v10 }
 0x4d5   : > { %v1147_v30 = vpop.trf.xlu2 }
 0x4d6   : > { %3309 = vmatmul.msk.bf16.vlgmr.msra.gmra.mxu2 %vm691_vm1, %v1147_v30  ;;  %v3401_v30 = vor.u32 %v4015_v9, %v3400_v8  ;;  %v3345_v8 = vor.u32 %v4000_v62, %v3344_v27  ;;  %v3349_v9 = vor.u32 %v3992_v1, %v3346_v2  ;;  %v4022_v27 = vld [vmem:[%s4411_s0 + $0x10] sm:$0xff]  ;;  %v4045_v1 = vld [vmem:[%s4411_s0 + $0xc8] sm:$0xff]  ;;  %v4028_v2 = vld [vmem:[%s4411_s0 + $0x40] sm:$0xff] }
 0x4d7   : > { %v4046_v62 = vld [vmem:[%s4411_s0 + $0xd0] sm:$0xff] }
 0x4d8   : > { %1571 = vmatpush.bf16.msra.mxu1 %v3401_v30  ;;  %v3357_v30 = vor.u32 %v3993_v4, %v3354_v7  ;;  %v4075_v4 = vld [vmem:[%s4411_s0 + $0x1b8] sm:$0xff]  ;;  %v4020_v7 = vld [vmem:[%s4411_s0] sm:$0xff] }
 0x559   : > { %v1179_v12 = vpop.f32.mrf.mxu2 }
 0x55a   : > { %v1180_v13 = vadd.f32 %v4179_v11, %v1179_v12  ;;  %v3402_v12 = vld [vmem:[%s4396_s1 + $0xd8] sm:$0xf0] }
 0x55c   : > { %v1184_v14 = vadd.f32 %v1180_v13, %v4425_v5  ;;  %v4489_v5 = vsel %vm1199_vm7, %v4218_v21, %v1198_v25  ;;  %v3328_v13 = vld [vmem:[%s4396_s1 + $0x10] sm:$0xf]  ;;  %v3330_v21 = vld [vmem:[%s4396_s1 + $0x50] sm:$0xf0]  ;;  %v3337_v25 = vor.u32 %v3999_v23, %v3336_v22 }
 0x55d   : > { %v4002_v22 = vld [vmem:[%s4396_s1 + $0x6c] sm:$0xf0] }
 0x55e   : > { %v1188_v15 = vsel %vm691_vm1, %v1184_v14, 0.0  ;;  %1572 = vmatpush.bf16.msra.mxu1 %v3337_v25  ;;  %v3994_v25 = vld [vmem:[%s4396_s1 + $0x34] sm:$0xf] }
 0x55f   : > { %1189 = vadd.xlane.f32.xlu1 %v1188_v15 }
 0x561   : > { %v1181_v16 = vpop.f32.mrf.mxu2 }
 0x562   : > { %v1182_v17 = vadd.f32 %v4179_v11, %v1181_v16  ;;  %v4007_v11 = vld [vmem:[%s4396_s1 + $0x9c] sm:$0xf] }
 0x563   : > { %v3405_v16 = vor.u32 %v4007_v11, %v3402_v12  ;;  %v3424_v11 = vld [vmem:[%s4396_s1 + $0xb0] sm:$0xf] }
 0x564   : > { %v1185_v18 = vadd.f32 %v1182_v17, %v4427_v6  ;;  %v3998_v17 = vld [vmem:[%s4396_s1 + $0x4c] sm:$0xf0] }
 0x565   : > { %v3329_v20 = vor.u32 %v3998_v17, %v3328_v13  ;;  %1585 = vmatpush.bf16.msra.mxu2 %v3405_v16  ;;  %v4018_v12 = vld [vmem:[%s4396_s1 + $0xec] sm:$0xf0]  ;;  %v4010_v13 = vld [vmem:[%s4396_s1 + $0xb4] sm:$0xf]  ;;  %v4019_v16 = vld [vmem:[%s4396_s1 + $0xf4] sm:$0xf0] }
 0x566   : > { %v1191_v19 = vsel %vm691_vm1, %v1185_v18, 0.0  ;;  %v4011_v17 = vld [vmem:[%s4396_s1 + $0xbc] sm:$0xf] }
 0x567   : > { %1192 = vadd.xlane.f32.xlu1 %v1191_v19  ;;  %1544 = vmatpush.bf16.msrb.mxu3 %v3329_v20 }
 0x5d2   : > { %v1190_v29 = vpop.xlane.xlu1 %1189 }
 0x5d3   : > { %v1201_v6 = vmul.f32 %v4489_v5, %v1190_v29  ;;  %v3991_v29 = vld [vmem:[%s4396_s1 + $0x1c] sm:$0xf] }
 0x5d5   : > { %v4492_v31 = vsub.f32 %v1184_v14, %v1201_v6  ;;  %v3338_v6 = vld [vmem:[%s4396_s1 + $0x58] sm:$0xf0] }
 0x5d7   : > { %v1205_v32 = vmul.f32 %v4492_v31, %v4492_v31 }
 0x5d9   : > { %v1207_v33 = vsel %vm691_vm1, %v1205_v32, 0.0 }
 0x5da   : > { %1208 = vadd.xlane.f32.xlu1 %v1207_v33  ;;  %v1193_v34 = vpop.xlane.xlu1 %1192  ;;  %v3341_v33 = vor.u32 %v3991_v29, %v3338_v6  ;;  %v3362_v29 = vld [vmem:[%s4396_s1 + $0x70] sm:$0xf0]  ;;  %v3368_v6 = vld [vmem:[%s4396_s1 + $0x38] sm:$0xf] }
 0x5db   : > { %v1202_v35 = vmul.f32 %v4489_v5, %v1193_v34 }
 0x5dc   : > { %1586 = vmatpush.bf16.msra.mxu2 %v3341_v33  ;;  %v3995_v33 = vld [vmem:[%s4396_s1 + $0x3c] sm:$0xf] }
 0x5dd   : > { %v4498_v36 = vsub.f32 %v1185_v18, %v1202_v35  ;;  %v3990_v18 = vld [vmem:[%s4396_s1 + $0x14] sm:$0xf] }
 0x5de   : > { %v3333_v24 = vor.u32 %v3990_v18, %v3330_v21  ;;  %v3434_v18 = vld [vmem:[%s4396_s1 + $0xf8] sm:$0xf0]  ;;  %v3360_v21 = vld [vmem:[%s4396_s1 + $0x30] sm:$0xf] }
 0x5df   : > { %v1206_v37 = vmul.f32 %v4498_v36, %v4498_v36 }
 0x5e0   : > { %1558 = vmatpush.bf16.msrb.mxu0 %v3333_v24  ;;  %v3437_v24 = vor.u32 %v4011_v17, %v3434_v18  ;;  %v4072_v17 = vld [vmem:[%s4411_s0 + $0x1a0] sm:$0xff]  ;;  %v4057_v18 = vld [vmem:[%s4411_s0 + $0x128] sm:$0xff] }
 0x5e1   : > { %v1210_v38 = vsel %vm691_vm1, %v1206_v37, 0.0 }
 0x5e2   : > { %1211 = vadd.xlane.f32.xlu1 %v1210_v38 }
 0x64d   : > { %v1209_v50 = vpop.xlane.xlu1 %1208 }
 0x64e   : > { %v1213_v26 = vmul.f32 %v1209_v50, %v4489_v5 }
 0x650   : > { %v1215_v59 = vadd.f32 1e-05, %v1213_v26  ;;  %v3408_v26 = vld [vmem:[%s4396_s1 + $0xa0] sm:$0xf] }
 0x652   : > { %4219 = vrsqrt.f32 %v1215_v59  ;;  %vm1223_vm9 = vweird.f32 %v1215_v59 }
 0x655   : > { %v1212_v0 = vpop.xlane.xlu1 %1211 }
 0x656   : > { %v1214_v28 = vmul.f32 %v1212_v0, %v4489_v5 }
 0x658   : > { %v4220_v14 = vpop.eup %4219  ;;  %v1216_v15 = vadd.f32 1e-05, %v1214_v28  ;;  %v4001_v28 = vld [vmem:[%s4396_s1 + $0x64] sm:$0xf0] }
 0x659   : > { %v1218_v19 = vmul.f32 %v4220_v14, %v1215_v59  ;;  %vm1224_vm8 = vweird.f32 %v4220_v14  ;;  %v3353_v10 = vor.u32 %v4001_v28, %v3352_v3  ;;  %v4036_v3 = vld [vmem:[%s4411_s0 + $0x80] sm:$0xff]  ;;  %v4067_v28 = vld [vmem:[%s4411_s0 + $0x178] sm:$0xff] }
 0x65a   : > { %4221 = vrsqrt.f32 %v1216_v15  ;;  %vm1225_vm10 = vmor %vm1223_vm9, %vm1224_vm8  ;;  %vm1233_vm12 = vweird.f32 %v1216_v15 }
 0x65b   : > { %v1219_v32 = vmul.f32 %v4220_v14, %v1218_v19  ;;  %v3425_v19 = vor.u32 %v4018_v12, %v3424_v11  ;;  %v4074_v11 = vld [vmem:[%s4411_s0 + $0x1b0] sm:$0xff] }
 0x65c   : > { %v4058_v12 = vld [vmem:[%s4411_s0 + $0x130] sm:$0xff] }
 0x65d   : > { %v1220_v34 = vmul.f32 0.5, %v1219_v32  ;;  %v4003_v32 = vld [vmem:[%s4396_s1 + $0x74] sm:$0xf0] }
 0x65f   : > { %v1221_v35 = vsub.f32 1.5, %v1220_v34  ;;  %v3370_v34 = vld [vmem:[%s4396_s1 + $0x78] sm:$0xf0] }
 0x660   : > { %v4222_v37 = vpop.eup %4221 }
 0x661   : > { %v1222_v38 = vmul.f32 %v4220_v14, %v1221_v35  ;;  %v1228_v39 = vmul.f32 %v4222_v37, %v1216_v15  ;;  %vm1234_vm11 = vweird.f32 %v4222_v37  ;;  %v3432_v15 = vld [vmem:[%s4396_s1 + $0xb8] sm:$0xf]  ;;  %v3361_v35 = vor.u32 %v4002_v22, %v3360_v21  ;;  %v4056_v22 = vld [vmem:[%s4411_s0 + $0x120] sm:$0xff] }
 0x662   : > { %vm1235_vm13 = vmor %vm1233_vm12, %vm1234_vm11  ;;  %v3433_v23 = vor.u32 %v4019_v16, %v3432_v15  ;;  %v4073_v15 = vld [vmem:[%s4411_s0 + $0x1a8] sm:$0xff]  ;;  %v4064_v16 = vld [vmem:[%s4411_s0 + $0x160] sm:$0xff] }
 0x663   : > { %v1229_v40 = vmul.f32 %v4222_v37, %v1228_v39  ;;  %v1226_v41 = vsel %vm1225_vm10, %v4220_v14, %v1222_v38  ;;  %v3426_v14 = vld [vmem:[%s4396_s1 + $0xf0] sm:$0xf0]  ;;  %v3369_v38 = vor.u32 %v4003_v32, %v3368_v6  ;;  %v3373_v39 = vor.u32 %v3995_v33, %v3370_v34  ;;  %v4071_v21 = vld [vmem:[%s4411_s0 + $0x198] sm:$0xff]  ;;  %v4061_v32 = vld [vmem:[%s4411_s0 + $0x148] sm:$0xff] }
 0x664   : > { %v1237_v45 = vmul.f32 %v1226_v41, %v4492_v31  ;;  %v4016_v31 = vld [vmem:[%s4396_s1 + $0xdc] sm:$0xf0]  ;;  %v3429_v20 = vor.u32 %v4010_v13, %v3426_v14  ;;  %v4043_v41 = vld [vmem:[%s4411_s0 + $0xb8] sm:$0xff]  ;;  %v4082_v13 = vld [vmem:[%s4411_s0 + $0x1f0] sm:$0xff] }
 0x665   : > { %v1230_v42 = vmul.f32 0.5, %v1229_v40  ;;  %v3409_v60 = vor.u32 %v4016_v31, %v3408_v26  ;;  %v4035_v40 = vld [vmem:[%s4411_s0 + $0x78] sm:$0xff]  ;;  %v4032_v26 = vld [vmem:[%s4411_s0 + $0x60] sm:$0xff]  ;;  %v4065_v14 = vld [vmem:[%s4411_s0 + $0x168] sm:$0xff] }
 0x666   : > { %v1242_v49 = vmul.f32 %v4180_v44, %v1237_v45  ;;  %v4042_v45 = vld [vmem:[%s4411_s0 + $0xb0] sm:$0xff]  ;;  %v4040_v31 = vld [vmem:[%s4411_s0 + $0xa0] sm:$0xff]  ;;  %v4079_v6 = vld [vmem:[%s4411_s0 + $0x1d8] sm:$0xff] }
 0x667   : > { %v1231_v43 = vsub.f32 1.5, %v1230_v42  ;;  %v4027_v42 = vld [vmem:[%s4411_s0 + $0x38] sm:$0xff]  ;;  %v4069_v33 = vld [vmem:[%s4411_s0 + $0x188] sm:$0xff]  ;;  %v4054_v34 = vld [vmem:[%s4411_s0 + $0x110] sm:$0xff] }
 0x668   : > { %v4554_v55 = vadd.f32 %v4181_v48, %v1242_v49  ;;  %v4041_v49 = vld [vmem:[%s4411_s0 + $0xa8] sm:$0xff] }
 0x669   : > { %v1232_v46 = vmul.f32 %v4222_v37, %v1231_v43  ;;  %v4051_v43 = vld [vmem:[%s4411_s0 + $0xf8] sm:$0xff] }
 0x66b   : > { %v1236_v47 = vsel %vm1235_vm13, %v4222_v37, %v1232_v46  ;;  %v3365_v37 = vor.u32 %v3994_v25, %v3362_v29  ;;  %v4026_v46 = vld [vmem:[%s4411_s0 + $0x30] sm:$0xff]  ;;  %v4055_v29 = vld [vmem:[%s4411_s0 + $0x118] sm:$0xff] }
 0x66c   : > { %v1238_v50 = vmul.f32 %v1236_v47, %v4498_v36  ;;  %v3418_v36 = vld [vmem:[%s4396_s1 + $0xe8] sm:$0xf0]  ;;  %v4050_v47 = vld [vmem:[%s4411_s0 + $0xf0] sm:$0xff] }
 0x66d   : > { %v3421_v0 = vor.u32 %v4009_v58, %v3418_v36  ;;  %v4023_v58 = vld [vmem:[%s4411_s0 + $0x18] sm:$0xff]  ;;  %v4070_v25 = vld [vmem:[%s4411_s0 + $0x190] sm:$0xff] }
 0x66e   : > { %v1243_v51 = vmul.f32 %v4180_v44, %v1238_v50  ;;  %v4034_v44 = vld [vmem:[%s4411_s0 + $0x70] sm:$0xff]  ;;  %v4025_v50 = vld [vmem:[%s4411_s0 + $0x28] sm:$0xff]  ;;  %v4047_v36 = vld [vmem:[%s4411_s0 + $0xd8] sm:$0xff] }
 0x670   : > { %v4556_v56 = vadd.f32 %v4181_v48, %v1243_v51  ;;  %v4033_v48 = vld [vmem:[%s4411_s0 + $0x68] sm:$0xff] }
 0x671   : > { %v4049_v51 = vld [vmem:[%s4411_s0 + $0xe8] sm:$0xff] }
 0x672   : > { %v4563_v59 = vpack.c.bf16 %v4556_v56, %v4554_v55 }
 0x674   : > { %3438 = vmatmul.msk.bf16.vlgmr.msra.gmra.mxu3 %vm691_vm1, %v4563_v59  ;;  %3439 = vmatmul.msk.bf16.vlgmr.msra.gmra.mxu0 %vm691_vm1, %v4563_v59 }
 0x675   : > { %3440 = vmatmul.msk.bf16.vlgmr.msrb.gmra.mxu1 %vm691_vm1, %v4563_v59  ;;  %3441 = vmatmul.msk.bf16.vlgmr.msrb.gmra.mxu2 %vm691_vm1, %v4563_v59 }
 0x676   : > { %1599 = vmatpush.bf16.msra.mxu3 %v3409_v60  ;;  %1613 = vmatpush.bf16.msra.mxu0 %v3413_v61  ;;  %v4030_v60 = vld [vmem:[%s4411_s0 + $0x50] sm:$0xff] }
 0x677   : > { %1627 = vmatpush.bf16.msrb.mxu1 %v3417_v63  ;;  %1641 = vmatpush.bf16.msrb.mxu2 %v3421_v0  ;;  %v4038_v61 = vld [vmem:[%s4411_s0 + $0x90] sm:$0xff]  ;;  %v4029_v63 = vld [vmem:[%s4411_s0 + $0x48] sm:$0xff] }
 0x678   : > { %v4021_v0 = vld [vmem:[%s4411_s0 + $0x8] sm:$0xff] }
 0x67a   : > { %1600 = vmatpush.bf16.msra.mxu3 %v3345_v8  ;;  %1614 = vmatpush.bf16.msra.mxu0 %v3349_v9  ;;  %v4044_v8 = vld [vmem:[%s4411_s0 + $0xc0] sm:$0xff]  ;;  %v4059_v9 = vld [vmem:[%s4411_s0 + $0x138] sm:$0xff] }
 0x67b   : > { %1628 = vmatpush.bf16.msrb.mxu1 %v3353_v10  ;;  %1642 = vmatpush.bf16.msrb.mxu2 %v3357_v30  ;;  %v4083_v10 = vld [vmem:[%s4411_s0 + $0x1f8] sm:$0xff]  ;;  %v4066_v30 = vld [vmem:[%s4411_s0 + $0x170] sm:$0xff] }
 0x684   : > { %3442 = vmatmul.msk.bf16.vlgmr.msrb.gmra.mxu3 %vm691_vm1, %v4563_v59  ;;  %3443 = vmatmul.msk.bf16.vlgmr.msrb.gmra.mxu0 %vm691_vm1, %v4563_v59 }
 0x685   : > { %3444 = vmatmul.msk.bf16.vlgmr.msra.gmra.mxu1 %vm691_vm1, %v4563_v59  ;;  %3445 = vmatmul.msk.bf16.vlgmr.msra.gmra.mxu2 %vm691_vm1, %v4563_v59 }
 0x686   : > { %1655 = vmatpush.bf16.msrb.mxu3 %v3425_v19  ;;  %1669 = vmatpush.bf16.msrb.mxu0 %v3429_v20  ;;  %v4081_v19 = vld [vmem:[%s4411_s0 + $0x1e8] sm:$0xff]  ;;  %v4063_v20 = vld [vmem:[%s4411_s0 + $0x158] sm:$0xff] }
 0x687   : > { %1683 = vmatpush.bf16.msra.mxu1 %v3433_v23  ;;  %1697 = vmatpush.bf16.msra.mxu2 %v3437_v24  ;;  %v4080_v23 = vld [vmem:[%s4411_s0 + $0x1e0] sm:$0xff]  ;;  %v4062_v24 = vld [vmem:[%s4411_s0 + $0x150] sm:$0xff] }
 0x68a   : > { %1656 = vmatpush.bf16.msrb.mxu3 %v3361_v35  ;;  %1670 = vmatpush.bf16.msrb.mxu0 %v3365_v37  ;;  %v4078_v35 = vld [vmem:[%s4411_s0 + $0x1d0] sm:$0xff]  ;;  %v4060_v37 = vld [vmem:[%s4411_s0 + $0x140] sm:$0xff] }
 0x68b   : > { %1684 = vmatpush.bf16.msra.mxu1 %v3369_v38  ;;  %1698 = vmatpush.bf16.msra.mxu2 %v3373_v39  ;;  %v4068_v38 = vld [vmem:[%s4411_s0 + $0x180] sm:$0xff]  ;;  %v4053_v39 = vld [vmem:[%s4411_s0 + $0x108] sm:$0xff] }
 0x694   : > { %3446 = vmatmul.msk.bf16.vlgmr.msra.gmra.mxu3 %vm691_vm1, %v4563_v59  ;;  %3447 = vmatmul.msk.bf16.vlgmr.msra.gmra.mxu0 %vm691_vm1, %v4563_v59 }
 0x695   : > { %3448 = vmatmul.msk.bf16.vlgmr.msrb.gmra.mxu1 %vm691_vm1, %v4563_v59  ;;  %3449 = vmatmul.msk.bf16.vlgmr.msrb.gmra.mxu2 %vm691_vm1, %v4563_v59 }
 0x696   : > { %2795 = vmatpush.bf16.msra.mxu0 %v4035_v40  ;;  %2809 = vmatpush.bf16.msrb.mxu1 %v4043_v41  ;;  %v4077_v40 = vld [vmem:[%s4411_s0 + $0x1c8] sm:$0xff]  ;;  %v4052_v41 = vld [vmem:[%s4411_s0 + $0x100] sm:$0xff] }
 0x697   : > { %2781 = vmatpush.bf16.msra.mxu3 %v4027_v42  ;;  %2823 = vmatpush.bf16.msrb.mxu2 %v4051_v43  ;;  %v4076_v42 = vld [vmem:[%s4411_s0 + $0x1c0] sm:$0xff] }
 0x698   : > { %v4686_v43 = vld [vmem:[%s4401_s3] sm:$0xff] }
 0x69a   : > { %2796 = vmatpush.bf16.msra.mxu0 %v4034_v44  ;;  %2810 = vmatpush.bf16.msrb.mxu1 %v4042_v45 }
 0x69b   : > { %2782 = vmatpush.bf16.msra.mxu3 %v4026_v46  ;;  %2824 = vmatpush.bf16.msrb.mxu2 %v4050_v47  ;;  %v1287_v46 = vperm.slane %v4686_v43, 1  ;;  %v1288_v47 = vperm.slane %v4686_v43, 2 }
 0x69e   : > { %2797 = vmatpush.bf16.msra.mxu0 %v4033_v48  ;;  %2811 = vmatpush.bf16.msrb.mxu1 %v4041_v49 }
 0x69f   : > { %2783 = vmatpush.bf16.msra.mxu3 %v4025_v50  ;;  %2825 = vmatpush.bf16.msrb.mxu2 %v4049_v51 }
 0x6a2   : > { %2798 = vmatpush.bf16.msra.mxu0 %v4032_v26  ;;  %2812 = vmatpush.bf16.msrb.mxu1 %v4040_v31  ;;  %v1286_v31 = vperm.slane %v4686_v43, 0 }
 0x6a3   : > { %2784 = vmatpush.bf16.msra.mxu3 %v4024_v52  ;;  %2826 = vmatpush.bf16.msrb.mxu2 %v4048_v53 }
 0x6a4   : > { %3450 = vmatmul.msk.bf16.vlgmr.msrb.gmra.mxu3 %vm691_vm1, %v4563_v59  ;;  %3451 = vmatmul.msk.bf16.vlgmr.msrb.gmra.mxu0 %vm691_vm1, %v4563_v59 }
 0x6a5   : > { %3452 = vmatmul.msk.bf16.vlgmr.msra.gmra.mxu1 %vm691_vm1, %v4563_v59  ;;  %3453 = vmatmul.msk.bf16.vlgmr.msra.gmra.mxu2 %vm691_vm1, %v4563_v59  ;;  %v4037_v59 = vld [vmem:[%s4411_s0 + $0x88] sm:$0xff] }
 0x6a6   : > { %2799 = vmatpush.bf16.msra.mxu0 %v4031_v54  ;;  %2813 = vmatpush.bf16.msrb.mxu1 %v4039_v57  ;;  %v1289_v54 = vperm.slane %v4686_v43, 3 }
 0x6a7   : > { %2785 = vmatpush.bf16.msra.mxu3 %v4023_v58  ;;  %2827 = vmatpush.bf16.msrb.mxu2 %v4047_v36 }
 0x6aa   : > { %2800 = vmatpush.bf16.msra.mxu0 %v4030_v60  ;;  %2814 = vmatpush.bf16.msrb.mxu1 %v4038_v61 }
 0x6ab   : > { %2786 = vmatpush.bf16.msra.mxu3 %v4022_v27  ;;  %2828 = vmatpush.bf16.msrb.mxu2 %v4046_v62  ;;  %v4099_v27 = vld [vmem:[%s4411_s0 + $0x278] sm:$0xff] }
 0x6ae   : > { %2801 = vmatpush.bf16.msra.mxu0 %v4029_v63  ;;  %2815 = vmatpush.bf16.msrb.mxu1 %v4037_v59  ;;  %v4107_v59 = vld [vmem:[%s4411_s0 + $0x2b8] sm:$0xff] }
 0x6af   : > { %2787 = vmatpush.bf16.msra.mxu3 %v4021_v0  ;;  %2829 = vmatpush.bf16.msrb.mxu2 %v4045_v1 }
 0x6b2   : > { %2802 = vmatpush.bf16.msra.mxu0 %v4028_v2  ;;  %2816 = vmatpush.bf16.msrb.mxu1 %v4036_v3 }
 0x6b3   : > { %2788 = vmatpush.bf16.msra.mxu3 %v4020_v7  ;;  %2830 = vmatpush.bf16.msrb.mxu2 %v4044_v8  ;;  %v4098_v8 = vld [vmem:[%s4411_s0 + $0x270] sm:$0xff] }
 0x6b6   : > { %2851 = vmatpush.bf16.msrb.mxu0 %v4067_v28  ;;  %2865 = vmatpush.bf16.msra.mxu1 %v4075_v4 }
 0x6b7   : > { %2837 = vmatpush.bf16.msrb.mxu3 %v4059_v9  ;;  %2879 = vmatpush.bf16.msra.mxu2 %v4083_v10 }
 0x6ba   : > { %2852 = vmatpush.bf16.msrb.mxu0 %v4066_v30  ;;  %2866 = vmatpush.bf16.msra.mxu1 %v4074_v11  ;;  %v4106_v11 = vld [vmem:[%s4411_s0 + $0x2b0] sm:$0xff] }
 0x6bb   : > { %2838 = vmatpush.bf16.msrb.mxu3 %v4058_v12  ;;  %2880 = vmatpush.bf16.msra.mxu2 %v4082_v13 }
 0x6be   : > { %2853 = vmatpush.bf16.msrb.mxu0 %v4065_v14  ;;  %2867 = vmatpush.bf16.msra.mxu1 %v4073_v15  ;;  %v4091_v14 = vld [vmem:[%s4411_s0 + $0x238] sm:$0xff] }
 0x6bf   : > { %2839 = vmatpush.bf16.msrb.mxu3 %v4057_v18  ;;  %2881 = vmatpush.bf16.msra.mxu2 %v4081_v19  ;;  %v1292_v19 = vperm.slane %v4686_v43, 6 }
 0x6c2   : > { %2854 = vmatpush.bf16.msrb.mxu0 %v4064_v16  ;;  %2868 = vmatpush.bf16.msra.mxu1 %v4072_v17  ;;  %v1291_v16 = vperm.slane %v4686_v43, 5  ;;  %v4115_v17 = vld [vmem:[%s4411_s0 + $0x2f8] sm:$0xff] }
 0x6c3   : > { %2840 = vmatpush.bf16.msrb.mxu3 %v4056_v22  ;;  %2882 = vmatpush.bf16.msra.mxu2 %v4080_v23  ;;  %v4090_v23 = vld [vmem:[%s4411_s0 + $0x230] sm:$0xff] }
 0x6c6   : > { %2855 = vmatpush.bf16.msrb.mxu0 %v4063_v20  ;;  %2869 = vmatpush.bf16.msra.mxu1 %v4071_v21  ;;  %v4097_v20 = vld [vmem:[%s4411_s0 + $0x268] sm:$0xff] }
 0x6c7   : > { %2841 = vmatpush.bf16.msrb.mxu3 %v4055_v29  ;;  %2883 = vmatpush.bf16.msra.mxu2 %v4079_v6  ;;  %v4105_v21 = vld [vmem:[%s4411_s0 + $0x2a8] sm:$0xff]  ;;  %v4114_v29 = vld [vmem:[%s4411_s0 + $0x2f0] sm:$0xff] }
 0x6ca   : > { %2856 = vmatpush.bf16.msrb.mxu0 %v4062_v24  ;;  %2870 = vmatpush.bf16.msra.mxu1 %v4070_v25 }
 0x6cb   : > { %2842 = vmatpush.bf16.msrb.mxu3 %v4054_v34  ;;  %2884 = vmatpush.bf16.msra.mxu2 %v4078_v35  ;;  %v1290_v34 = vperm.slane %v4686_v43, 4 }
 0x6ce   : > { %2857 = vmatpush.bf16.msrb.mxu0 %v4061_v32  ;;  %2871 = vmatpush.bf16.msra.mxu1 %v4069_v33  ;;  %v4096_v33 = vld [vmem:[%s4411_s0 + $0x260] sm:$0xff] }
 0x6cf   : > { %2843 = vmatpush.bf16.msrb.mxu3 %v4053_v39  ;;  %2885 = vmatpush.bf16.msra.mxu2 %v4077_v40  ;;  %v1293_v39 = vperm.slane %v4686_v43, 7 }
 0x6d2   : > { %2858 = vmatpush.bf16.msrb.mxu0 %v4060_v37  ;;  %2872 = vmatpush.bf16.msra.mxu1 %v4068_v38  ;;  %v4104_v38 = vld [vmem:[%s4411_s0 + $0x2a0] sm:$0xff] }
 0x6d3   : > { %2844 = vmatpush.bf16.msrb.mxu3 %v4052_v41  ;;  %2886 = vmatpush.bf16.msra.mxu2 %v4076_v42  ;;  %v4089_v41 = vld [vmem:[%s4411_s0 + $0x228] sm:$0xff] }
 0x6f1   : > { %v1504_v44 = vpop.f32.mrf.mxu0 }
 0x6f2   : > { %v1518_v45 = vpop.f32.mrf.mxu1  ;;  %v1505_v49 = vadd.f32 %v1504_v44, %v1287_v46 }
 0x6f3   : > { %v1519_v51 = vadd.f32 %v1518_v45, %v1288_v47  ;;  %v4113_v45 = vld [vmem:[%s4411_s0 + $0x2e8] sm:$0xff] }
 0x6f4   : > { %v1706_v58 = vmax.f32 %v1505_v49, 0.0 }
 0x6f5   : > { %v1707_v60 = vmax.f32 %v1519_v51, 0.0  ;;  %v4103_v51 = vld [vmem:[%s4411_s0 + $0x298] sm:$0xff] }
 0x6f7   : > { %v1490_v48 = vpop.f32.mrf.mxu3 }
 0x6f8   : > { %v1532_v50 = vpop.f32.mrf.mxu2  ;;  %v1491_v62 = vadd.f32 %v1490_v48, %v1286_v31  ;;  %v4095_v48 = vld [vmem:[%s4411_s0 + $0x258] sm:$0xff] }
 0x6f9   : > { %v1506_v26 = vpop.f32.mrf.mxu0  ;;  %v1533_v0 = vadd.f32 %v1532_v50, %v1289_v54 }
 0x6fa   : > { %v1507_v52 = vadd.f32 %v1506_v26, %v1287_v46  ;;  %v1520_v53 = vpop.f32.mrf.mxu1  ;;  %v1705_v9 = vmax.f32 %v1491_v62, 0.0 }
 0x6fb   : > { %v1521_v57 = vadd.f32 %v1520_v53, %v1288_v47  ;;  %v1708_v12 = vmax.f32 %v1533_v0, 0.0 }
 0x6fc   : > { %v1722_v36 = vmax.f32 %v1507_v52, 0.0  ;;  %v4088_v52 = vld [vmem:[%s4411_s0 + $0x220] sm:$0xff] }
 0x6fd   : > { %v1723_v61 = vmax.f32 %v1521_v57, 0.0  ;;  %v4112_v57 = vld [vmem:[%s4411_s0 + $0x2e0] sm:$0xff] }
 0x6fe   : > { %v1738_v63 = vpack.c.bf16 %v1722_v36, %v1706_v58  ;;  %v4715_v36 = vld [vmem:[%s4401_s3 + $0x8] sm:$0xff] }
 0x6ff   : > { %v1739_v1 = vpack.c.bf16 %v1723_v61, %v1707_v60  ;;  %v1492_v2 = vpop.f32.mrf.mxu3  ;;  %v4094_v61 = vld [vmem:[%s4411_s0 + $0x250] sm:$0xff] }
 0x700   : > { %v1493_v3 = vadd.f32 %v1492_v2, %v1286_v31  ;;  %v1534_v28 = vpop.f32.mrf.mxu2  ;;  %2803 = vmatmul.bf16.vlgmr.msra.gmra.mxu0 %v1738_v63  ;;  %v4087_v2 = vld [vmem:[%s4411_s0 + $0x218] sm:$0xff] }
 0x701   : > { %v1535_v4 = vadd.f32 %v1534_v28, %v1289_v54  ;;  %2817 = vmatmul.bf16.vlgmr.msrb.gmra.mxu1 %v1739_v1  ;;  %2907 = vmatpush.bf16.msra.mxu0 %v4099_v27  ;;  %v1560_v7 = vpop.f32.mrf.mxu0  ;;  %v1295_v28 = vperm.slane %v4715_v36, 1 }
 0x702   : > { %v1721_v10 = vmax.f32 %v1493_v3, 0.0  ;;  %2921 = vmatpush.bf16.msrb.mxu1 %v4107_v59  ;;  %v1574_v30 = vpop.f32.mrf.mxu1  ;;  %v1561_v24 = vadd.f32 %v1560_v7, %v1291_v16  ;;  %v4102_v59 = vld [vmem:[%s4411_s0 + $0x290] sm:$0xff] }
 0x703   : > { %v1724_v13 = vmax.f32 %v1535_v4, 0.0  ;;  %v1575_v6 = vadd.f32 %v1574_v30, %v1292_v19  ;;  %v4111_v4 = vld [vmem:[%s4411_s0 + $0x2d8] sm:$0xff] }
 0x704   : > { %v1737_v15 = vpack.c.bf16 %v1721_v10, %v1705_v9  ;;  %v1710_v42 = vmax.f32 %v1561_v24, 0.0  ;;  %v4093_v9 = vld [vmem:[%s4411_s0 + $0x248] sm:$0xff] }
 0x705   : > { %v1740_v18 = vpack.c.bf16 %v1724_v13, %v1708_v12  ;;  %2908 = vmatpush.bf16.msra.mxu0 %v4098_v8  ;;  %v1711_v46 = vmax.f32 %v1575_v6, 0.0  ;;  %v1296_v8 = vperm.slane %v4715_v36, 2  ;;  %v4101_v10 = vld [vmem:[%s4411_s0 + $0x288] sm:$0xff] }
 0x706   : > { %2922 = vmatpush.bf16.msrb.mxu1 %v4106_v11  ;;  %2789 = vmatmul.bf16.vlgmr.msra.gmra.mxu3 %v1737_v15  ;;  %v4086_v11 = vld [vmem:[%s4411_s0 + $0x210] sm:$0xff] }
 0x707   : > { %2831 = vmatmul.bf16.vlgmr.msrb.gmra.mxu2 %v1740_v18  ;;  %2893 = vmatpush.bf16.msra.mxu3 %v4091_v14  ;;  %v1546_v22 = vpop.f32.mrf.mxu3  ;;  %v4110_v14 = vld [vmem:[%s4411_s0 + $0x2d0] sm:$0xff]  ;;  %v1294_v18 = vperm.slane %v4715_v36, 0 }
 0x708   : > { %2935 = vmatpush.bf16.msrb.mxu2 %v4115_v17  ;;  %v1588_v25 = vpop.f32.mrf.mxu2  ;;  %v1547_v49 = vadd.f32 %v1546_v22, %v1290_v34  ;;  %v4092_v17 = vld [vmem:[%s4411_s0 + $0x240] sm:$0xff]  ;;  %v4131_v22 = vld [vmem:[%s4411_s0 + $0x378] sm:$0xff] }
 0x709   : > { %2909 = vmatpush.bf16.msra.mxu0 %v4097_v20  ;;  %v1562_v32 = vpop.f32.mrf.mxu0  ;;  %v1589_v43 = vadd.f32 %v1588_v25, %v1293_v39  ;;  %v4139_v25 = vld [vmem:[%s4411_s0 + $0x3b8] sm:$0xff] }
 0x70a   : > { %2923 = vmatpush.bf16.msrb.mxu1 %v4105_v21  ;;  %v1563_v35 = vadd.f32 %v1562_v32, %v1291_v16  ;;  %v1576_v37 = vpop.f32.mrf.mxu1  ;;  %v1709_v27 = vmax.f32 %v1547_v49, 0.0  ;;  %v4100_v21 = vld [vmem:[%s4411_s0 + $0x280] sm:$0xff]  ;;  %v4123_v49 = vld [vmem:[%s4411_s0 + $0x338] sm:$0xff] }
 0x70b   : > { %v1577_v40 = vadd.f32 %v1576_v37, %v1292_v19  ;;  %2894 = vmatpush.bf16.msra.mxu3 %v4090_v23  ;;  %v1712_v0 = vmax.f32 %v1589_v43, 0.0  ;;  %v1297_v23 = vperm.slane %v4715_v36, 3 }
 0x70c   : > { %v1726_v44 = vmax.f32 %v1563_v35, 0.0  ;;  %2936 = vmatpush.bf16.msrb.mxu2 %v4114_v29  ;;  %v4085_v29 = vld [vmem:[%s4411_s0 + $0x208] sm:$0xff] }
 0x70d   : > { %v1727_v47 = vmax.f32 %v1577_v40, 0.0  ;;  %2910 = vmatpush.bf16.msra.mxu0 %v4096_v33  ;;  %v4109_v33 = vld [vmem:[%s4411_s0 + $0x2c8] sm:$0xff] }
 0x70e   : > { %v1742_v50 = vpack.c.bf16 %v1726_v44, %v1710_v42  ;;  %2924 = vmatpush.bf16.msrb.mxu1 %v4104_v38  ;;  %v4138_v44 = vld [vmem:[%s4411_s0 + $0x3b0] sm:$0xff] }
 0x70f   : > { %v1743_v26 = vpack.c.bf16 %v1727_v47, %v1711_v46  ;;  %2895 = vmatpush.bf16.msra.mxu3 %v4089_v41  ;;  %v1548_v31 = vpop.f32.mrf.mxu3 }
 0x710   : > { %2937 = vmatpush.bf16.msrb.mxu2 %v4113_v45  ;;  %v1549_v53 = vadd.f32 %v1548_v31, %v1290_v34  ;;  %v1590_v54 = vpop.f32.mrf.mxu2  ;;  %2859 = vmatmul.bf16.vlgmr.msrb.gmra.mxu0 %v1742_v50  ;;  %v4084_v45 = vld [vmem:[%s4411_s0 + $0x200] sm:$0xff]  ;;  %v4129_v31 = vld [vmem:[%s4411_s0 + $0x368] sm:$0xff] }
 0x711   : > { %v1591_v58 = vadd.f32 %v1590_v54, %v1293_v39  ;;  %2873 = vmatmul.bf16.vlgmr.msra.gmra.mxu1 %v1743_v26  ;;  %2911 = vmatpush.bf16.msra.mxu0 %v4095_v48  ;;  %v1616_v60 = vpop.f32.mrf.mxu0  ;;  %v4130_v39 = vld [vmem:[%s4411_s0 + $0x370] sm:$0xff]  ;;  %v4108_v48 = vld [vmem:[%s4411_s0 + $0x2c0] sm:$0xff]  ;;  %v4137_v54 = vld [vmem:[%s4411_s0 + $0x3a8] sm:$0xff] }
 0x712   : > { %v1725_v62 = vmax.f32 %v1549_v53, 0.0  ;;  %2925 = vmatpush.bf16.msrb.mxu1 %v4103_v51  ;;  %v1630_v63 = vpop.f32.mrf.mxu1  ;;  %v1617_v12 = vadd.f32 %v1616_v60, %v1295_v28  ;;  %v4147_v51 = vld [vmem:[%s4411_s0 + $0x3f8] sm:$0xff] }
 0x713   : > { %v1728_v1 = vmax.f32 %v1591_v58, 0.0  ;;  %2896 = vmatpush.bf16.msra.mxu3 %v4088_v52  ;;  %v1631_v15 = vadd.f32 %v1630_v63, %v1296_v8  ;;  %v4122_v58 = vld [vmem:[%s4411_s0 + $0x330] sm:$0xff] }
 0x714   : > { %v1741_v3 = vpack.c.bf16 %v1725_v62, %v1709_v27  ;;  %2938 = vmatpush.bf16.msrb.mxu2 %v4112_v57  ;;  %v1714_v6 = vmax.f32 %v1617_v12, 0.0  ;;  %v4128_v62 = vld [vmem:[%s4411_s0 + $0x360] sm:$0xff]  ;;  %v1299_v12 = vperm.slane %v4715_v36, 5 }
 0x715   : > { %v1744_v7 = vpack.c.bf16 %v1728_v1, %v1712_v0  ;;  %2912 = vmatpush.bf16.msra.mxu0 %v4094_v61  ;;  %v1715_v34 = vmax.f32 %v1631_v15, 0.0  ;;  %v4146_v61 = vld [vmem:[%s4411_s0 + $0x3f0] sm:$0xff]  ;;  %v4121_v0 = vld [vmem:[%s4411_s0 + $0x328] sm:$0xff]  ;;  %v1300_v15 = vperm.slane %v4715_v36, 6 }
 0x716   : > { %2926 = vmatpush.bf16.msrb.mxu1 %v4102_v59  ;;  %2845 = vmatmul.bf16.vlgmr.msrb.gmra.mxu3 %v1741_v3  ;;  %v4136_v59 = vld [vmem:[%s4411_s0 + $0x3a0] sm:$0xff]  ;;  %v4145_v1 = vld [vmem:[%s4411_s0 + $0x3e8] sm:$0xff]  ;;  %v4135_v3 = vld [vmem:[%s4411_s0 + $0x398] sm:$0xff] }
 0x717   : > { %2887 = vmatmul.bf16.vlgmr.msra.gmra.mxu2 %v1744_v7  ;;  %2897 = vmatpush.bf16.msra.mxu3 %v4087_v2  ;;  %v1602_v30 = vpop.f32.mrf.mxu3  ;;  %v4127_v2 = vld [vmem:[%s4411_s0 + $0x358] sm:$0xff] }
 0x718   : > { %2939 = vmatpush.bf16.msrb.mxu2 %v4111_v4  ;;  %v1644_v13 = vpop.f32.mrf.mxu2  ;;  %v1603_v37 = vadd.f32 %v1602_v30, %v1294_v18  ;;  %v4120_v4 = vld [vmem:[%s4411_s0 + $0x320] sm:$0xff] }
 0x719   : > { %2913 = vmatpush.bf16.msra.mxu0 %v4093_v9  ;;  %v1618_v16 = vpop.f32.mrf.mxu0  ;;  %v1645_v40 = vadd.f32 %v1644_v13, %v1297_v23  ;;  %v4126_v9 = vld [vmem:[%s4411_s0 + $0x350] sm:$0xff] }
 0x71a   : > { %2927 = vmatpush.bf16.msrb.mxu1 %v4101_v10  ;;  %v1619_v19 = vadd.f32 %v1618_v16, %v1295_v28  ;;  %v1632_v20 = vpop.f32.mrf.mxu1  ;;  %v1713_v43 = vmax.f32 %v1603_v37, 0.0  ;;  %v4134_v10 = vld [vmem:[%s4411_s0 + $0x390] sm:$0xff]  ;;  %v4125_v16 = vld [vmem:[%s4411_s0 + $0x348] sm:$0xff] }
 0x71b   : > { %v1633_v24 = vadd.f32 %v1632_v20, %v1296_v8  ;;  %2898 = vmatpush.bf16.msra.mxu3 %v4086_v11  ;;  %v1716_v52 = vmax.f32 %v1645_v40, 0.0  ;;  %v4144_v8 = vld [vmem:[%s4411_s0 + $0x3e0] sm:$0xff]  ;;  %v4119_v11 = vld [vmem:[%s4411_s0 + $0x318] sm:$0xff]  ;;  %v4118_v20 = vld [vmem:[%s4411_s0 + $0x310] sm:$0xff] }
 0x71c   : > { %v1730_v32 = vmax.f32 %v1619_v19, 0.0  ;;  %2940 = vmatpush.bf16.msrb.mxu2 %v4110_v14  ;;  %v4143_v14 = vld [vmem:[%s4411_s0 + $0x3d8] sm:$0xff]  ;;  %v4117_v37 = vld [vmem:[%s4411_s0 + $0x308] sm:$0xff] }
 0x71d   : > { %v1731_v35 = vmax.f32 %v1633_v24, 0.0  ;;  %2914 = vmatpush.bf16.msra.mxu0 %v4092_v17  ;;  %v4141_v40 = vld [vmem:[%s4411_s0 + $0x3c8] sm:$0xff] }
 0x71e   : > { %v1746_v38 = vpack.c.bf16 %v1730_v32, %v1714_v6  ;;  %2928 = vmatpush.bf16.msrb.mxu1 %v4100_v21 }
 0x71f   : > { %v1747_v41 = vpack.c.bf16 %v1731_v35, %v1715_v34  ;;  %2899 = vmatpush.bf16.msra.mxu3 %v4085_v29  ;;  %v1604_v42 = vpop.f32.mrf.mxu3  ;;  %v1298_v29 = vperm.slane %v4715_v36, 4  ;;  %v1301_v34 = vperm.slane %v4715_v36, 7 }
 0x720   : > { %2941 = vmatpush.bf16.msrb.mxu2 %v4109_v33  ;;  %v1605_v46 = vadd.f32 %v1604_v42, %v1294_v18  ;;  %v1646_v47 = vpop.f32.mrf.mxu2  ;;  %2915 = vmatmul.bf16.vlgmr.msra.gmra.mxu0 %v1746_v38  ;;  %v4133_v18 = vld [vmem:[%s4411_s0 + $0x388] sm:$0xff]  ;;  %v4132_v33 = vld [vmem:[%s4411_s0 + $0x380] sm:$0xff] }
 0x721   : > { %2963 = vmatpush.bf16.msrb.mxu0 %v4131_v22  ;;  %v1647_v50 = vadd.f32 %v1646_v47, %v1297_v23  ;;  %2929 = vmatmul.bf16.vlgmr.msrb.gmra.mxu1 %v1747_v41  ;;  %v1672_v27 = vpop.f32.mrf.mxu0  ;;  %v4142_v22 = vld [vmem:[%s4411_s0 + $0x3d0] sm:$0xff] }
 0x722   : > { %2977 = vmatpush.bf16.msra.mxu1 %v4139_v25  ;;  %v1729_v26 = vmax.f32 %v1605_v46, 0.0  ;;  %v1686_v63 = vpop.f32.mrf.mxu1  ;;  %v1673_v21 = vadd.f32 %v1672_v27, %v1299_v12  ;;  %v4124_v25 = vld [vmem:[%s4411_s0 + $0x340] sm:$0xff] }
 0x723   : > { %v1732_v53 = vmax.f32 %v1647_v50, 0.0  ;;  %2900 = vmatpush.bf16.msra.mxu3 %v4084_v45  ;;  %v1687_v23 = vadd.f32 %v1686_v63, %v1300_v15  ;;  %v4182_v27 = vld [vmem:[%s649_s14] ss:$0 sm:$0xff] }
 0x724   : > { %v1745_v57 = vpack.c.bf16 %v1729_v26, %v1713_v43  ;;  %2942 = vmatpush.bf16.msrb.mxu2 %v4108_v48  ;;  %v1718_v38 = vmax.f32 %v1673_v21, 0.0  ;;  %v4116_v48 = vld [vmem:[%s4411_s0 + $0x300] sm:$0xff] }
 0x725   : > { %2964 = vmatpush.bf16.msrb.mxu0 %v4130_v39  ;;  %v1748_v60 = vpack.c.bf16 %v1732_v53, %v1716_v52  ;;  %v1719_v41 = vmax.f32 %v1687_v23, 0.0 }
 0x726   : > { %2978 = vmatpush.bf16.msra.mxu1 %v4138_v44  ;;  %2901 = vmatmul.bf16.vlgmr.msra.gmra.mxu3 %v1745_v57 }
 0x727   : > { %2949 = vmatpush.bf16.msrb.mxu3 %v4123_v49  ;;  %2943 = vmatmul.bf16.vlgmr.msrb.gmra.mxu2 %v1748_v60  ;;  %v1658_v28 = vpop.f32.mrf.mxu3  ;;  %v4140_v49 = vld [vmem:[%s4411_s0 + $0x3c0] sm:$0xff] }
 0x728   : > { %2991 = vmatpush.bf16.msra.mxu2 %v4147_v51  ;;  %v1700_v7 = vpop.f32.mrf.mxu2  ;;  %v1659_v44 = vadd.f32 %v1658_v28, %v1298_v29 }
 0x729   : > { %2965 = vmatpush.bf16.msrb.mxu0 %v4129_v31  ;;  %v1674_v30 = vpop.f32.mrf.mxu0  ;;  %v1701_v46 = vadd.f32 %v1700_v7, %v1301_v34 }
 0x72a   : > { %2979 = vmatpush.bf16.msra.mxu1 %v4137_v54  ;;  %v1688_v13 = vpop.f32.mrf.mxu1  ;;  %v1675_v17 = vadd.f32 %v1674_v30, %v1299_v12  ;;  %v1717_v51 = vmax.f32 %v1659_v44, 0.0 }
 0x72b   : > { %2950 = vmatpush.bf16.msrb.mxu3 %v4122_v58  ;;  %v1689_v19 = vadd.f32 %v1688_v13, %v1300_v15  ;;  %v1720_v43 = vmax.f32 %v1701_v46, 0.0 }
 0x72c   : > { %2992 = vmatpush.bf16.msra.mxu2 %v4146_v61  ;;  %v1734_v6 = vmax.f32 %v1675_v17, 0.0 }
 0x72d   : > { %2966 = vmatpush.bf16.msrb.mxu0 %v4128_v62  ;;  %v1735_v35 = vmax.f32 %v1689_v19, 0.0 }
 0x72e   : > { %2980 = vmatpush.bf16.msra.mxu1 %v4136_v59  ;;  %v1750_v45 = vpack.c.bf16 %v1734_v6, %v1718_v38 }
 0x72f   : > { %2951 = vmatpush.bf16.msrb.mxu3 %v4121_v0  ;;  %v1660_v24 = vpop.f32.mrf.mxu3  ;;  %v1751_v47 = vpack.c.bf16 %v1735_v35, %v1719_v41 }
 0x730   : > { %2993 = vmatpush.bf16.msra.mxu2 %v4145_v1  ;;  %v1702_v32 = vpop.f32.mrf.mxu2  ;;  %v1661_v39 = vadd.f32 %v1660_v24, %v1298_v29 }
 0x731   : > { %2967 = vmatpush.bf16.msrb.mxu0 %v4127_v2  ;;  %v1703_v42 = vadd.f32 %v1702_v32, %v1301_v34 }
 0x732   : > { %2981 = vmatpush.bf16.msra.mxu1 %v4135_v3  ;;  %v1733_v36 = vmax.f32 %v1661_v39, 0.0 }
 0x733   : > { %2952 = vmatpush.bf16.msrb.mxu3 %v4120_v4  ;;  %v1736_v50 = vmax.f32 %v1703_v42, 0.0 }
 0x734   : > { %2994 = vmatpush.bf16.msra.mxu2 %v4144_v8  ;;  %v1749_v26 = vpack.c.bf16 %v1733_v36, %v1717_v51 }
 0x735   : > { %2968 = vmatpush.bf16.msrb.mxu0 %v4126_v9  ;;  %v1752_v31 = vpack.c.bf16 %v1736_v50, %v1720_v43 }
 0x736   : > { %2982 = vmatpush.bf16.msra.mxu1 %v4134_v10 }
 0x737   : > { %2953 = vmatpush.bf16.msrb.mxu3 %v4119_v11 }
 0x738   : > { %2995 = vmatpush.bf16.msra.mxu2 %v4143_v14 }
 0x739   : > { %2969 = vmatpush.bf16.msrb.mxu0 %v4125_v16 }
 0x73a   : > { %2983 = vmatpush.bf16.msra.mxu1 %v4133_v18 }
 0x73b   : > { %2954 = vmatpush.bf16.msrb.mxu3 %v4118_v20 }
 0x73c   : > { %2996 = vmatpush.bf16.msra.mxu2 %v4142_v22 }
 0x73d   : > { %2970 = vmatpush.bf16.msrb.mxu0 %v4124_v25 }
 0x73e   : > { %2984 = vmatpush.bf16.msra.mxu1 %v4132_v33 }
 0x73f   : > { %2955 = vmatpush.bf16.msrb.mxu3 %v4117_v37 }
 0x740   : > { %2997 = vmatpush.bf16.msra.mxu2 %v4141_v40  ;;  %2971 = vmatmul.bf16.vlgmr.msrb.gmra.mxu0 %v1750_v45 }
 0x741   : > { %2985 = vmatmul.bf16.vlgmr.msra.gmra.mxu1 %v1751_v47 }
 0x743   : > { %2956 = vmatpush.bf16.msrb.mxu3 %v4116_v48 }
 0x744   : > { %2998 = vmatpush.bf16.msra.mxu2 %v4140_v49 }
 0x746   : > { %2957 = vmatmul.bf16.vlgmr.msrb.gmra.mxu3 %v1749_v26 }
 0x747   : > { %2999 = vmatmul.bf16.vlgmr.msra.gmra.mxu2 %v1752_v31 }
 0x77d   : > { %v2804_v52 = vpop.f32.mrf.mxu0 }
 0x77e   : > { %v2818_v54 = vpop.f32.mrf.mxu1 }
 0x785   : > { %v2806_v58 = vpop.f32.mrf.mxu0 }
 0x786   : > { %v2820_v61 = vpop.f32.mrf.mxu1 }
 0x789   : > { %v2790_v53 = vpop.f32.mrf.mxu3 }
 0x78a   : > { %v2832_v57 = vpop.f32.mrf.mxu2  ;;  %v2791_v63 = vadd.f32 %v4182_v27, %v2790_v53 }
 0x78c   : > { %v2805_v1 = vadd.f32 %v2804_v52, %v2791_v63 }
 0x78d   : > { %v2860_v59 = vpop.f32.mrf.mxu0 }
 0x78e   : > { %v2874_v2 = vpop.f32.mrf.mxu1  ;;  %v2819_v28 = vadd.f32 %v2818_v54, %v2805_v1 }
 0x790   : > { %v2833_v7 = vadd.f32 %v2832_v57, %v2819_v28 }
 0x791   : > { %v2792_v60 = vpop.f32.mrf.mxu3 }
 0x792   : > { %v2834_v62 = vpop.f32.mrf.mxu2  ;;  %v2793_v4 = vadd.f32 %v4182_v27, %v2792_v60 }
 0x794   : > { %v2807_v8 = vadd.f32 %v2806_v58, %v2793_v4 }
 0x795   : > { %v2862_v9 = vpop.f32.mrf.mxu0 }
 0x796   : > { %v2876_v11 = vpop.f32.mrf.mxu1  ;;  %v2821_v12 = vadd.f32 %v2820_v61, %v2807_v8 }
 0x798   : > { %v2835_v15 = vadd.f32 %v2834_v62, %v2821_v12 }
 0x799   : > { %v2846_v0 = vpop.f32.mrf.mxu3 }
 0x79a   : > { %v2888_v3 = vpop.f32.mrf.mxu2  ;;  %v2847_v30 = vadd.f32 %v2846_v0, %v2833_v7 }
 0x79c   : > { %v2861_v14 = vadd.f32 %v2860_v59, %v2847_v30 }
 0x79d   : > { %v2916_v18 = vpop.f32.mrf.mxu0 }
 0x79e   : > { %v2875_v16 = vadd.f32 %v2874_v2, %v2861_v14  ;;  %v2930_v20 = vpop.f32.mrf.mxu1 }
 0x7a0   : > { %v2889_v21 = vadd.f32 %v2888_v3, %v2875_v16 }
 0x7a1   : > { %v2848_v10 = vpop.f32.mrf.mxu3 }
 0x7a2   : > { %v2890_v13 = vpop.f32.mrf.mxu2  ;;  %v2849_v17 = vadd.f32 %v2848_v10, %v2835_v15 }
 0x7a4   : > { %v2863_v22 = vadd.f32 %v2862_v9, %v2849_v17 }
 0x7a5   : > { %v2918_v6 = vpop.f32.mrf.mxu0 }
 0x7a6   : > { %v2877_v25 = vadd.f32 %v2876_v11, %v2863_v22  ;;  %v2932_v34 = vpop.f32.mrf.mxu1 }
 0x7a8   : > { %v2891_v33 = vadd.f32 %v2890_v13, %v2877_v25 }
 0x7a9   : > { %v2902_v19 = vpop.f32.mrf.mxu3 }
 0x7aa   : > { %v2944_v23 = vpop.f32.mrf.mxu2  ;;  %v2903_v24 = vadd.f32 %v2902_v19, %v2889_v21  ;;  %v4183_v19 = vld [vmem:[%s652_s24] ss:$0 sm:$0xff] }
 0x7ab   : > { %v4184_v21 = vld [vmem:[%s655_s28] ss:$0 sm:$0xff]  ;;  %s4848_s28 = sld [smem:[#allocation10_spill]] (!%p3966_p5) }
 0x7ac   : > { %v2917_v29 = vadd.f32 %v2916_v18, %v2903_v24 }
 0x7ae   : > { %v2931_v35 = vadd.f32 %v2930_v20, %v2917_v29 }
 0x7b0   : > { %v2945_v39 = vadd.f32 %v2944_v23, %v2931_v35 }
 0x7b1   : > { %v2904_v32 = vpop.f32.mrf.mxu3 }
 0x7b2   : > { %v2905_v37 = vadd.f32 %v2904_v32, %v2891_v33  ;;  %v2946_v38 = vpop.f32.mrf.mxu2 }
 0x7b4   : > { %v2919_v40 = vadd.f32 %v2918_v6, %v2905_v37 }
 0x7b6   : > { %v2933_v46 = vadd.f32 %v2932_v34, %v2919_v40 }
 0x7b8   : > { %v2947_v49 = vadd.f32 %v2946_v38, %v2933_v46 }
 0x7bd   : > { %v2972_v41 = vpop.f32.mrf.mxu0 }
 0x7be   : > { %v2986_v45 = vpop.f32.mrf.mxu1 }
 0x7c5   : > { %v2974_v31 = vpop.f32.mrf.mxu0 }
 0x7c6   : > { %v2988_v54 = vpop.f32.mrf.mxu1 }
 0x7c9   : > { %v2958_v42 = vpop.f32.mrf.mxu3 }
 0x7ca   : > { %v2959_v44 = vadd.f32 %v2958_v42, %v2945_v39  ;;  %v3000_v48 = vpop.f32.mrf.mxu2 }
 0x7cc   : > { %v2973_v47 = vadd.f32 %v2972_v41, %v2959_v44 }
 0x7ce   : > { %v2987_v36 = vadd.f32 %v2986_v45, %v2973_v47 }
 0x7d0   : > { %v3001_v50 = vadd.f32 %v3000_v48, %v2987_v36 }
 0x7d1   : > { %v2960_v51 = vpop.f32.mrf.mxu3 }
 0x7d2   : > { %v2961_v43 = vadd.f32 %v2960_v51, %v2947_v49  ;;  %v3005_v26 = vadd.f32 %v3001_v50, %v4554_v55  ;;  %v3002_v58 = vpop.f32.mrf.mxu2 }
 0x7d4   : > { %v2975_v52 = vadd.f32 %v2974_v31, %v2961_v43  ;;  %v3009_v53 = vsel %vm691_vm1, %v3005_v26, 0.0 }
 0x7d5   : > { %3010 = vadd.xlane.f32.xlu1 %v3009_v53 }
 0x7d6   : > { %v2989_v57 = vadd.f32 %v2988_v54, %v2975_v52 }
 0x7d8   : > { %v3003_v60 = vadd.f32 %v3002_v58, %v2989_v57 }
 0x7da   : > { %v3006_v61 = vadd.f32 %v3003_v60, %v4556_v56 }
 0x7dc   : > { %v3012_v27 = vsel %vm691_vm1, %v3006_v61, 0.0 }
 0x7dd   : > { %3013 = vadd.xlane.f32.xlu0 %v3012_v27 }
 0x848   : > { %v3011_v62 = vpop.xlane.xlu1 %3010 }
 0x849   : > { %v3015_v63 = vmul.f32 %v3011_v62, %v4489_v5 }
 0x84b   : > { %v3017_v59 = vsub.f32 %v3005_v26, %v3015_v63 }
 0x84d   : > { %v3019_v0 = vmul.f32 %v3017_v59, %v3017_v59 }
 0x84f   : > { %v3021_v55 = vsel %vm691_vm1, %v3019_v0, 0.0 }
 0x850   : > { %v3014_v1 = vpop.xlane.xlu0 %3013  ;;  %3022 = vadd.xlane.f32.xlu1 %v3021_v55 }
 0x851   : > { %v3016_v2 = vmul.f32 %v3014_v1, %v4489_v5 }
 0x853   : > { %v3018_v3 = vsub.f32 %v3006_v61, %v3016_v2 }
 0x855   : > { %v3020_v28 = vmul.f32 %v3018_v3, %v3018_v3 }
 0x857   : > { %v3024_v4 = vsel %vm691_vm1, %v3020_v28, 0.0 }
 0x858   : > { %3025 = vadd.xlane.f32.xlu0 %v3024_v4 }
 0x8c3   : > { %v3023_v56 = vpop.xlane.xlu1 %3022 }
 0x8c4   : > { %v3027_v7 = vmul.f32 %v3023_v56, %v4489_v5 }
 0x8c6   : > { %v3029_v8 = vadd.f32 1e-05, %v3027_v7 }
 0x8c8   : > { %4223 = vrsqrt.f32 %v3029_v8  ;;  %vm3037_vm15 = vweird.f32 %v3029_v8 }
 0x8cb   : > { %v3026_v9 = vpop.xlane.xlu0 %3025 }
 0x8cc   : > { %v3028_v10 = vmul.f32 %v3026_v9, %v4489_v5 }
 0x8ce   : > { %v4224_v30 = vpop.eup %4223  ;;  %v3030_v11 = vadd.f32 1e-05, %v3028_v10 }
 0x8cf   : > { %v3032_v12 = vmul.f32 %v4224_v30, %v3029_v8  ;;  %vm3038_vm14 = vweird.f32 %v4224_v30 }
 0x8d0   : > { %4225 = vrsqrt.f32 %v3030_v11  ;;  %vm3039_vm0 = vmor %vm3037_vm15, %vm3038_vm14  ;;  %vm3047_vm3 = vweird.f32 %v3030_v11 }
 0x8d1   : > { %v3033_v13 = vmul.f32 %v4224_v30, %v3032_v12 }
 0x8d3   : > { %v3034_v14 = vmul.f32 0.5, %v3033_v13 }
 0x8d5   : > { %v3035_v15 = vsub.f32 1.5, %v3034_v14 }
 0x8d6   : > { %v4226_v16 = vpop.eup %4225 }
 0x8d7   : > { %v3036_v17 = vmul.f32 %v4224_v30, %v3035_v15  ;;  %v3042_v18 = vmul.f32 %v4226_v16, %v3030_v11  ;;  %vm3048_vm2 = vweird.f32 %v4226_v16 }
 0x8d8   : > { %vm3049_vm4 = vmor %vm3047_vm3, %vm3048_vm2 }
 0x8d9   : > { %v3040_v5 = vsel %vm3039_vm0, %v4224_v30, %v3036_v17  ;;  %v3043_v20 = vmul.f32 %v4226_v16, %v3042_v18 }
 0x8da   : > { %v3051_v22 = vmul.f32 %v3040_v5, %v3017_v59 }
 0x8db   : > { %v3044_v23 = vmul.f32 0.5, %v3043_v20 }
 0x8dc   : > { %v3056_v24 = vmul.f32 %v4183_v19, %v3051_v22 }
 0x8dd   : > { %v3045_v25 = vsub.f32 1.5, %v3044_v23 }
 0x8de   : > { %v3061_v29 = vadd.f32 %v4184_v21, %v3056_v24 }
 0x8df   : > { %v3046_v6 = vmul.f32 %v4226_v16, %v3045_v25 }
 0x8e0   : > { %3063 = vst.msk [vmem:[#allocation2] sm:$0xff] %vm691_vm1, %v3061_v29 }
 0x8e1   : > { %v3050_v32 = vsel %vm3049_vm4, %v4226_v16, %v3046_v6 }
 0x8e2   : > { %v3052_v33 = vmul.f32 %v3050_v32, %v3018_v3 }
 0x8e4   : > { %v3057_v34 = vmul.f32 %v4183_v19, %v3052_v33  ;;  %3068 = sbr.rel (%p3966_p5) target bundleno = 2426 (0x97a), region = 88 }
 0x8e6   : > { %v3062_v35 = vadd.f32 %v4184_v21, %v3057_v34 }
 0x8e8   : > { %3064 = vst.msk [vmem:[#allocation2 + $0x8] sm:$0xff] %vm691_vm1, %v3062_v35 }
 0x8e9   : > { %v4149_v37 = vld [vmem:[%s4848_s28 + $0x8] sm:$0xff]  ;;  %v4148_v38 = vld [vmem:[%s4848_s28] sm:$0xff]  ;;  %v3069_v39 = vpack.c.bf16 %v3062_v35, %v3061_v29 }
 0x8ea   : > { %3099 = vmatpush.bf16.msra.mxu0 %v4149_v37  ;;  %v4227_v40 = vld [vmem:[%s4849_s30] ss:$0 sm:$0xff] }
 0x8ee   : > { %3100 = vmatpush.bf16.msra.mxu0 %v4148_v38 }
 0x8f1   : > { %3975 = vmatmul.msk.bf16.vlgmr.msra.gmra.mxu0 %vm691_vm1, %v3069_v39 }
 0x96e   : > { %v3102_v41 = vpop.f32.mrf.mxu0 }
 0x96f   : > { %v3103_v42 = vadd.f32 %v4227_v40, %v3102_v41 }
 0x971   : > { %3107 = vst [vmem:[#allocation3] sm:$0xff] %v3103_v42 }
 0x976   : > { %v3104_v44 = vpop.f32.mrf.mxu0 }
 0x977   : > { %v3105_v45 = vadd.f32 %v4227_v40, %v3104_v44 }
 0x979   : > { %3108 = vst [vmem:[#allocation3 + $0x8] sm:$0xff] %v3105_v45 }
 0x97a PF: > { %p4158_p6 = scmp.eq.s32.totalorder %s4359_s19, 1  ;;  %s4270_s15 = smov [#allocation3]  }
 0x97b   : > { %s3114_s22 = sshll.u32 %s4270_s15, 4  ;;  %s4850_s21 = sld [smem:[#allocation12_spill]]  ;;  %s3115_s22 = int_to_ptr.vmem [resolvable:$true] %s3114_s22 }
 0x97c   : > { %s4271_s1 = smov 128   ;;  %s4272_s3 = smov 8  }
 0x981   : > { %s3116_s29 = sshll.u32 %s4850_s21, 4  ;;  %s3117_s29 = int_to_ptr.hbm [resolvable:$true] %s3116_s29 }
 0x982   : > { %4155 = dma.vmem_to_hbm [thread:$0]  (%p4158_p6), %s3115_s22, 256, %s3117_s29, [#allocation4], %s4271_s1, %s4271_s1, %s4272_s3  }
 0x983   : > { %4261 = dma.done.wait (%p4158_p6), [#allocation4], 256  }
 0x984   : > { %4263 = vsyncadd (%p4158_p6), [#allocation4], 4294967040 }
 0x985 PF: > { %s4851_s14 = sld [smem:[#allocation6_spill]] }
 0x98b   : > { %s26_s18 = sadd.s32 1, %s4851_s14  }
 0x98c   : > { %p23_p7 = scmp.ge.s32.totalorder %s26_s18, 4  }
 0x98e   :  { %25 = sbr.rel (!%p23_p7) target bundleno = 8 (0x8), region = 148 }
 0x993   :  { %3133 = vsyncpa [#allocation4], 1 }
 0x994   :  { %3135 = vsyncpa [#allocation4 + $0x1], 1 }

</bundles_post_ra>
